<compile_context>
chip_gen: v7x
topology: tpu7x:2x2x1
jax: 0.10.0
libtpu: 0.0.40
codegen_flags: <defaults>
</compile_context>

<pallas_src>
import functools
import math

import jax
import jax.numpy as jnp
from jax import lax
from jax.experimental import pallas as pl
from jax.experimental.pallas import tpu as pltpu


def _round_up(x, m):
    return (x + m - 1) // m * m


def _flash_attn_kernel(xq_ref, xkv_ref, wq_ref, wkv_ref, o_ref,
                       q_sc, m_sc, l_sc, acc_sc,
                       *, scale, dk_pad, seq_len, tk, needs_mask):
    ki = pl.program_id(2)
    nk = pl.num_programs(2)

    @pl.when(ki == 0)
    def _init():
        # Q projection once per query tile, pre-scaled by 1/sqrt(key_size).
        q = jnp.dot(xq_ref[...], wq_ref[...],
                    preferred_element_type=jnp.float32)
        q_sc[...] = (q * scale).astype(q_sc.dtype)
        m_sc[...] = jnp.full_like(m_sc, -jnp.inf)
        l_sc[...] = jnp.zeros_like(l_sc)
        acc_sc[...] = jnp.zeros_like(acc_sc)

    # Fused K/V projection for this key/value tile: one lane-dense matmul
    # (N = dk_pad + dv_pad >= 256), f32 accumulation on the MXU.
    kv = jnp.dot(xkv_ref[...], wkv_ref[...],
                 preferred_element_type=jnp.float32)
    k = kv[:, :dk_pad].astype(xkv_ref.dtype)
    v = kv[:, dk_pad:].astype(xkv_ref.dtype)

    # scores = (Q * scale) K^T : contract last dim of both, no transpose.
    scores = lax.dot_general(q_sc[...], k, (((1,), (1,)), ((), ())),
                             preferred_element_type=jnp.float32)

    if needs_mask:
        # Mask out zero-padded key positions (seq padded up to the tile size).
        key_pos = ki * tk + lax.broadcasted_iota(jnp.int32, scores.shape, 1)
        scores = jnp.where(key_pos < seq_len, scores, -jnp.inf)

    # Online softmax update.
    m_prev = m_sc[...]
    m_new = jnp.maximum(m_prev, jnp.max(scores, axis=-1, keepdims=True))
    alpha = jnp.exp(m_prev - m_new)
    p = jnp.exp(scores - m_new)
    l_sc[...] = alpha * l_sc[...] + jnp.sum(p, axis=-1, keepdims=True)
    acc_sc[...] = alpha * acc_sc[...] + jnp.dot(
        p.astype(v.dtype), v, preferred_element_type=jnp.float32)
    m_sc[...] = m_new

    @pl.when(ki == nk - 1)
    def _finalize():
        inv_l = pl.reciprocal(l_sc[...], approx=True)
        o_ref[...] = (acc_sc[...] * inv_l).astype(o_ref.dtype)


def attention_layer(x, wq, wk, wv):
    """x: [B, S, D_in]; wq/wk/wv: [D_in, Dq/Dk/Dv]; returns [B, S, Dv]."""
    B, S, D_in = x.shape
    Dq, Dk, Dv = wq.shape[1], wk.shape[1], wv.shape[1]
    assert wq.shape[0] == D_in and wk.shape[0] == D_in and wv.shape[0] == D_in
    assert Dq == Dk, "query/key dims must match for QK^T"

    dtype = x.dtype

    # Pad head dims to lane-dense 128 multiples; pad seq to the tile size.
    DQK_PAD = _round_up(Dq, 128)
    DV_PAD = _round_up(Dv, 128)
    Sr = _round_up(S, 128)
    T = min(256, Sr)               # 256-wide tiles when S is large enough
    S_pad = _round_up(S, T)

    x_p = jnp.pad(x, ((0, 0), (0, S_pad - S), (0, 0)))
    wq_p = jnp.pad(wq.astype(dtype), ((0, 0), (0, DQK_PAD - Dq)))
    wk_p = jnp.pad(wk.astype(dtype), ((0, 0), (0, DQK_PAD - Dk)))
    wv_p = jnp.pad(wv.astype(dtype), ((0, 0), (0, DV_PAD - Dv)))
    wkv_p = jnp.concatenate([wk_p, wv_p], axis=1)   # (D_in, DQK_PAD + DV_PAD)

    grid = (B, S_pad // T, S_pad // T)
    scale = 1.0 / math.sqrt(float(Dk))

    kernel = functools.partial(
        _flash_attn_kernel,
        scale=scale, dk_pad=DQK_PAD, seq_len=S, tk=T,
        needs_mask=(S != S_pad))

    out = pl.pallas_call(
        kernel,
        out_shape=jax.ShapeDtypeStruct((B, S_pad, DV_PAD), dtype),
        grid=grid,
        in_specs=[
            # x for the query tile
            pl.BlockSpec((pl.Squeezed(), T, D_in), lambda b, qi, ki: (b, qi, 0)),
            # x for the key/value tile
            pl.BlockSpec((pl.Squeezed(), T, D_in), lambda b, qi, ki: (b, ki, 0)),
            # Wq (padded), resident
            pl.BlockSpec((D_in, DQK_PAD), lambda b, qi, ki: (0, 0)),
            # Fused [Wk | Wv] (padded), resident
            pl.BlockSpec((D_in, DQK_PAD + DV_PAD), lambda b, qi, ki: (0, 0)),
        ],
        out_specs=pl.BlockSpec((pl.Squeezed(), T, DV_PAD),
                               lambda b, qi, ki: (b, qi, 0)),
        scratch_shapes=[
            pltpu.VMEM((T, DQK_PAD), dtype),     # Q tile (pre-scaled)
            pltpu.VMEM((T, 1), jnp.float32),     # running max m
            pltpu.VMEM((T, 1), jnp.float32),     # running sum l
            pltpu.VMEM((T, DV_PAD), jnp.float32),  # output accumulator
        ],
        compiler_params=pltpu.CompilerParams(
            dimension_semantics=("parallel", "parallel", "arbitrary")),
    )(x_p, x_p, wq_p, wkv_p)

    return out[:, :S, :Dv]


def attention_layer_ref(x, wq, wk, wv):
    """Pure-JAX reference for correctness check."""
    q = jnp.einsum("bsd,de->bse", x, wq)
    k = jnp.einsum("bsd,de->bse", x, wk)
    v = jnp.einsum("bsd,de->bse", x, wv)
    scores = jnp.einsum("bqe,bke->bqk", q, k) / jnp.sqrt(float(wk.shape[1]))
    p = jax.nn.softmax(scores, axis=-1)
    return jnp.einsum("bqk,bkd->bqd", p, v)


if __name__ == "__main__":
    # Small deterministic shapes consistent with the module:
    # input_size=32, query_size=key_size=32, value_size=32, batch=2, seq=8
    B, S, D_in = 2, 8, 32
    Dq = Dk = 32
    Dv = 32

    key = jax.random.PRNGKey(0)
    kx, kq, kk, kv = jax.random.split(key, 4)
    x = jax.random.normal(kx, (B, S, D_in), dtype=jnp.float32)
    wq = jax.random.normal(kq, (D_in, Dq), dtype=jnp.float32)
    wk = jax.random.normal(kk, (D_in, Dk), dtype=jnp.float32)
    wv = jax.random.normal(kv, (D_in, Dv), dtype=jnp.float32)

    out = attention_layer(x, wq, wk, wv)
    out = jax.block_until_ready(out)

    ref = attention_layer_ref(x, wq, wk, wv)
    assert out.shape == (B, S, Dv)
    # Tolerance slightly relaxed vs exact-f32 to accommodate the approximate
    # (EUP) reciprocal used for the softmax denominator.
    assert jnp.allclose(out, ref, atol=5e-3, rtol=5e-3), "mismatch vs reference"

    print("KERNEL_OK")
</pallas_src>

<mosaic_0001>
module attributes {stable_mosaic.version = 11 : i64} {
  func.func @_flash_attn_kernel(%arg0: i32, %arg1: i32, %arg2: i32, %arg3: memref<1x128x32xf32, #tpu.memory_space<vmem>>, %arg4: memref<1x128x32xf32, #tpu.memory_space<vmem>>, %arg5: memref<32x128xf32, #tpu.memory_space<vmem>>, %arg6: memref<32x256xf32, #tpu.memory_space<vmem>>, %arg7: memref<1x128x128xf32, #tpu.memory_space<vmem>>, %arg8: memref<128x128xf32, #tpu.memory_space<vmem>>, %arg9: memref<128x1xf32, #tpu.memory_space<vmem>>, %arg10: memref<128x1xf32, #tpu.memory_space<vmem>>, %arg11: memref<128x128xf32, #tpu.memory_space<vmem>>) attributes {dimension_semantics = [#tpu.dimension_semantics<parallel>, #tpu.dimension_semantics<parallel>, #tpu.dimension_semantics<arbitrary>], iteration_bounds = array<i64: 2, 1, 1>, scalar_prefetch = 0 : i64, scratch_operands = 4 : i64, tpu.core_type = #tpu.core_type<tc>, window_params = [{transform_indices = @transform_0, window_bounds = array<i64: 1, 128, 32>}, {transform_indices = @transform_1, window_bounds = array<i64: 1, 128, 32>}, {pipeline_mode = #tpu.pipeline_mode<synchronous>, transform_indices = @transform_2, window_bounds = array<i64: 32, 128>}, {pipeline_mode = #tpu.pipeline_mode<synchronous>, transform_indices = @transform_3, window_bounds = array<i64: 32, 256>}, {transform_indices = @transform_4, window_bounds = array<i64: 1, 128, 128>}]} {
    %c0_i32 = arith.constant 0 : i32
    %0 = arith.cmpi eq, %arg2, %c0_i32 : i32
    %1 = arith.extui %0 : i1 to i32
    %c0_i32_0 = arith.constant 0 : i32
    %2 = arith.cmpi ne, %1, %c0_i32_0 : i32
    scf.if %2 {
      %c0_26 = arith.constant 0 : index
      %c0_27 = arith.constant 0 : index
      %c0_28 = arith.constant 0 : index
      %44 = vector.load %arg3[%c0_26, %c0_27, %c0_28] : memref<1x128x32xf32, #tpu.memory_space<vmem>>, vector<1x128x32xf32>
      %45 = vector.shape_cast %44 : vector<1x128x32xf32> to vector<128x32xf32>
      %c0_29 = arith.constant 0 : index
      %c0_30 = arith.constant 0 : index
      %46 = vector.load %arg5[%c0_29, %c0_30] : memref<32x128xf32, #tpu.memory_space<vmem>>, vector<32x128xf32>
      %cst_31 = arith.constant dense<0.000000e+00> : vector<128x128xf32>
      %47 = tpu.matmul %45, %46, %cst_31 {dimension_numbers = #tpu.dot_dimension_numbers<[1], [0], [0], [1], [0, 0, 1, 1], [], []>} : vector<128x32xf32>, vector<32x128xf32>, vector<128x128xf32> -> vector<128x128xf32>
      %cst_32 = arith.constant 0.176776692 : f32
      %48 = vector.broadcast %cst_32 : f32 to vector<128x128xf32>
      %49 = arith.mulf %47, %48 : vector<128x128xf32>
      %c0_33 = arith.constant 0 : index
      %c0_34 = arith.constant 0 : index
      %50 = vector.load %arg8[%c0_33, %c0_34] : memref<128x128xf32, #tpu.memory_space<vmem>>, vector<128x128xf32>
      tpu.vector_store %arg8[%c0_33, %c0_34], %49 {strides = array<i32>} : memref<128x128xf32, #tpu.memory_space<vmem>>, vector<128x128xf32>,
      %cst_35 = arith.constant 0xFF800000 : f32
      %51 = vector.broadcast %cst_35 : f32 to vector<128x1xf32>
      %c0_36 = arith.constant 0 : index
      %c0_37 = arith.constant 0 : index
      %52 = vector.load %arg9[%c0_36, %c0_37] : memref<128x1xf32, #tpu.memory_space<vmem>>, vector<128x1xf32>
      tpu.vector_store %arg9[%c0_36, %c0_37], %51 {strides = array<i32>} : memref<128x1xf32, #tpu.memory_space<vmem>>, vector<128x1xf32>,
      %cst_38 = arith.constant 0.000000e+00 : f32
      %53 = vector.broadcast %cst_38 : f32 to vector<128x1xf32>
      %c0_39 = arith.constant 0 : index
      %c0_40 = arith.constant 0 : index
      %54 = vector.load %arg10[%c0_39, %c0_40] : memref<128x1xf32, #tpu.memory_space<vmem>>, vector<128x1xf32>
      tpu.vector_store %arg10[%c0_39, %c0_40], %53 {strides = array<i32>} : memref<128x1xf32, #tpu.memory_space<vmem>>, vector<128x1xf32>,
      %cst_41 = arith.constant 0.000000e+00 : f32
      %55 = vector.broadcast %cst_41 : f32 to vector<128x128xf32>
      %c0_42 = arith.constant 0 : index
      %c0_43 = arith.constant 0 : index
      %56 = vector.load %arg11[%c0_42, %c0_43] : memref<128x128xf32, #tpu.memory_space<vmem>>, vector<128x128xf32>
      tpu.vector_store %arg11[%c0_42, %c0_43], %55 {strides = array<i32>} : memref<128x128xf32, #tpu.memory_space<vmem>>, vector<128x128xf32>,
    } else {
    }
    %c0 = arith.constant 0 : index
    %c0_1 = arith.constant 0 : index
    %c0_2 = arith.constant 0 : index
    %3 = vector.load %arg4[%c0, %c0_1, %c0_2] : memref<1x128x32xf32, #tpu.memory_space<vmem>>, vector<1x128x32xf32>
    %4 = vector.shape_cast %3 : vector<1x128x32xf32> to vector<128x32xf32>
    %c0_3 = arith.constant 0 : index
    %c0_4 = arith.constant 0 : index
    %5 = vector.load %arg6[%c0_3, %c0_4] : memref<32x256xf32, #tpu.memory_space<vmem>>, vector<32x256xf32>
    %cst = arith.constant dense<0.000000e+00> : vector<128x256xf32>
    %6 = tpu.matmul %4, %5, %cst {dimension_numbers = #tpu.dot_dimension_numbers<[1], [0], [0], [1], [0, 0, 1, 1], [], []>} : vector<128x32xf32>, vector<32x256xf32>, vector<128x256xf32> -> vector<128x256xf32>
    %7 = vector.extract_strided_slice %6 {offsets = [0, 0], sizes = [128, 128], strides = [1, 1]} : vector<128x256xf32> to vector<128x128xf32>
    %8 = vector.extract_strided_slice %6 {offsets = [0, 128], sizes = [128, 128], strides = [1, 1]} : vector<128x256xf32> to vector<128x128xf32>
    %c0_5 = arith.constant 0 : index
    %c0_6 = arith.constant 0 : index
    %9 = vector.load %arg8[%c0_5, %c0_6] : memref<128x128xf32, #tpu.memory_space<vmem>>, vector<128x128xf32>
    %cst_7 = arith.constant dense<0.000000e+00> : vector<128x128xf32>
    %10 = tpu.matmul %9, %7, %cst_7 {dimension_numbers = #tpu.dot_dimension_numbers<[1], [1], [0], [0], [0, 0, 1, 0], [], []>} : vector<128x128xf32>, vector<128x128xf32>, vector<128x128xf32> -> vector<128x128xf32>
    %c128_i32 = arith.constant 128 : i32
    %11 = arith.muli %arg2, %c128_i32 : i32
    %12 = tpu.iota {dimensions = array<i32: 1>} : vector<128x128xi32>
    %13 = vector.broadcast %11 : i32 to vector<128x128xi32>
    %14 = arith.addi %13, %12 : vector<128x128xi32>
    %c8_i32 = arith.constant 8 : i32
    %15 = vector.broadcast %c8_i32 : i32 to vector<128x128xi32>
    %16 = arith.cmpi slt, %14, %15 : vector<128x128xi32>
    %cst_8 = arith.constant 0xFF800000 : f32
    %17 = vector.broadcast %cst_8 : f32 to vector<128x128xf32>
    %18 = arith.select %16, %10, %17 : vector<128x128xi1>, vector<128x128xf32>
    %c0_9 = arith.constant 0 : index
    %c0_10 = arith.constant 0 : index
    %19 = vector.load %arg9[%c0_9, %c0_10] : memref<128x1xf32, #tpu.memory_space<vmem>>, vector<128x1xf32>
    %cst_11 = arith.constant dense<0xFF800000> : vector<128xf32>
    %20 = vector.multi_reduction <maximumf>, %18, %cst_11 [1] : vector<128x128xf32> to vector<128xf32>
    %21 = vector.shape_cast %20 : vector<128xf32> to vector<128x1xf32>
    %22 = arith.maximumf %19, %21 : vector<128x1xf32>
    %23 = arith.subf %19, %22 : vector<128x1xf32>
    %24 = math.exp %23 : vector<128x1xf32>
    %25 = vector.broadcast %22 : vector<128x1xf32> to vector<128x128xf32>
    %26 = arith.subf %18, %25 : vector<128x128xf32>
    %27 = math.exp %26 : vector<128x128xf32>
    %c0_12 = arith.constant 0 : index
    %c0_13 = arith.constant 0 : index
    %28 = vector.load %arg10[%c0_12, %c0_13] : memref<128x1xf32, #tpu.memory_space<vmem>>, vector<128x1xf32>
    %29 = arith.mulf %24, %28 : vector<128x1xf32>
    %cst_14 = arith.constant dense<0.000000e+00> : vector<128xf32>
    %30 = vector.multi_reduction <add>, %27, %cst_14 [1] : vector<128x128xf32> to vector<128xf32>
    %31 = vector.shape_cast %30 : vector<128xf32> to vector<128x1xf32>
    %32 = arith.addf %29, %31 : vector<128x1xf32>
    %c0_15 = arith.constant 0 : index
    %c0_16 = arith.constant 0 : index
    %33 = vector.load %arg10[%c0_15, %c0_16] : memref<128x1xf32, #tpu.memory_space<vmem>>, vector<128x1xf32>
    tpu.vector_store %arg10[%c0_15, %c0_16], %32 {strides = array<i32>} : memref<128x1xf32, #tpu.memory_space<vmem>>, vector<128x1xf32>,
    %c0_17 = arith.constant 0 : index
    %c0_18 = arith.constant 0 : index
    %34 = vector.load %arg11[%c0_17, %c0_18] : memref<128x128xf32, #tpu.memory_space<vmem>>, vector<128x128xf32>
    %35 = vector.broadcast %24 : vector<128x1xf32> to vector<128x128xf32>
    %36 = arith.mulf %35, %34 : vector<128x128xf32>
    %cst_19 = arith.constant dense<0.000000e+00> : vector<128x128xf32>
    %37 = tpu.matmul %27, %8, %cst_19 {dimension_numbers = #tpu.dot_dimension_numbers<[1], [0], [0], [1], [0, 0, 1, 1], [], []>} : vector<128x128xf32>, vector<128x128xf32>, vector<128x128xf32> -> vector<128x128xf32>
    %38 = arith.addf %36, %37 : vector<128x128xf32>
    %c0_20 = arith.constant 0 : index
    %c0_21 = arith.constant 0 : index
    %39 = vector.load %arg11[%c0_20, %c0_21] : memref<128x128xf32, #tpu.memory_space<vmem>>, vector<128x128xf32>
    tpu.vector_store %arg11[%c0_20, %c0_21], %38 {strides = array<i32>} : memref<128x128xf32, #tpu.memory_space<vmem>>, vector<128x128xf32>,
    %c0_22 = arith.constant 0 : index
    %c0_23 = arith.constant 0 : index
    %40 = vector.load %arg9[%c0_22, %c0_23] : memref<128x1xf32, #tpu.memory_space<vmem>>, vector<128x1xf32>
    tpu.vector_store %arg9[%c0_22, %c0_23], %22 {strides = array<i32>} : memref<128x1xf32, #tpu.memory_space<vmem>>, vector<128x1xf32>,
    %c0_i32_24 = arith.constant 0 : i32
    %41 = arith.cmpi eq, %arg2, %c0_i32_24 : i32
    %42 = arith.extui %41 : i1 to i32
    %c0_i32_25 = arith.constant 0 : i32
    %43 = arith.cmpi ne, %42, %c0_i32_25 : i32
    scf.if %43 {
      %c0_26 = arith.constant 0 : index
      %c0_27 = arith.constant 0 : index
      %44 = vector.load %arg10[%c0_26, %c0_27] : memref<128x1xf32, #tpu.memory_space<vmem>>, vector<128x1xf32>
      %45 = tpu.reciprocal %44 {approx = true} : vector<128x1xf32> -> vector<128x1xf32>
      %c0_28 = arith.constant 0 : index
      %c0_29 = arith.constant 0 : index
      %46 = vector.load %arg11[%c0_28, %c0_29] : memref<128x128xf32, #tpu.memory_space<vmem>>, vector<128x128xf32>
      %47 = vector.broadcast %45 : vector<128x1xf32> to vector<128x128xf32>
      %48 = arith.mulf %46, %47 : vector<128x128xf32>
      %c0_30 = arith.constant 0 : index
      %c0_31 = arith.constant 0 : index
      %c0_32 = arith.constant 0 : index
      %49 = vector.load %arg7[%c0_30, %c0_31, %c0_32] : memref<1x128x128xf32, #tpu.memory_space<vmem>>, vector<1x128x128xf32>
      %50 = vector.shape_cast %49 : vector<1x128x128xf32> to vector<128x128xf32>
      %51 = vector.shape_cast %48 : vector<128x128xf32> to vector<1x128x128xf32>
      tpu.vector_store %arg7[%c0_30, %c0_31, %c0_32], %51 {strides = array<i32>} : memref<1x128x128xf32, #tpu.memory_space<vmem>>, vector<1x128x128xf32>,
    } else {
    }
    return
  }
  func.func @transform_0(%arg0: i32, %arg1: i32, %arg2: i32) -> (i32, i32, i32) {
    %c0_i32 = arith.constant 0 : i32
    %c0_i32_0 = arith.constant 0 : i32
    return %arg0, %arg1, %c0_i32 : i32, i32, i32
  }
  func.func @transform_1(%arg0: i32, %arg1: i32, %arg2: i32) -> (i32, i32, i32) {
    %c0_i32 = arith.constant 0 : i32
    %c0_i32_0 = arith.constant 0 : i32
    return %arg0, %arg2, %c0_i32 : i32, i32, i32
  }
  func.func @transform_2(%arg0: i32, %arg1: i32, %arg2: i32) -> (i32, i32) {
    %c0_i32 = arith.constant 0 : i32
    %c0_i32_0 = arith.constant 0 : i32
    %c0_i32_1 = arith.constant 0 : i32
    return %c0_i32, %c0_i32_0 : i32, i32
  }
  func.func @transform_3(%arg0: i32, %arg1: i32, %arg2: i32) -> (i32, i32) {
    %c0_i32 = arith.constant 0 : i32
    %c0_i32_0 = arith.constant 0 : i32
    %c0_i32_1 = arith.constant 0 : i32
    return %c0_i32, %c0_i32_0 : i32, i32
  }
  func.func @transform_4(%arg0: i32, %arg1: i32, %arg2: i32) -> (i32, i32, i32) {
    %c0_i32 = arith.constant 0 : i32
    %c0_i32_0 = arith.constant 0 : i32
    return %arg0, %arg1, %c0_i32 : i32, i32, i32
  }
}

</mosaic_0001>

<bundles_post_ra>
// kernel: tpu_custom_call.1
= control target key start
LH: loop header
LB: loop body
LE: loop exit
PB: predicated region body
PF: predicated region fallthrough
CT: control target
= control target key end

     0   :  { %9 = vsyncpa [#allocation7], 0  ;;  %s3269_s0 = inlined_call_operand.vmem [shape: f32[2,128,32], index: 0, kind: input, shape index: {}]   ;;  %s3270_s1 = inlined_call_operand.vmem [shape: f32[2,128,32], index: 1, kind: input, shape index: {}]   ;;  %s3271_s2 = inlined_call_operand.vmem [shape: f32[32,128], index: 2, kind: input, shape index: {}]   ;;  %s3272_s3 = inlined_call_operand.vmem [shape: f32[32,256], index: 3, kind: input, shape index: {}]   ;;  %s3273_s4 = inlined_call_operand.hbm [shape: f32[2,128,128], index: 4, kind: output, shape index: {}]  }
   0x1   :  { %11 = vsyncpa [#allocation7 + $0x1], 0  ;;  %s2534_s15 = smov 0   ;;  %s2536_s16 = smov 0  }
   0x2   :  { %s2538_s17 = smov 0   ;;  %s2540_s18 = smov 0  }
   0x3   :  { %s2542_s19 = smov 0   ;;  %s2544_s20 = smov 0  }
   0x4 LB: > { %s1907_s21 = sadd.s32 4294967295, %s2501_s20   ;;  %s1908_s22 = sadd.s32 4294967294, %s2501_s20   ;;  %s2501_s20 = sphi %s2544_s20, %s17_s20   ;;  %s2497_s19 = sphi %s2542_s19, %s3294_s19   ;;  %s2493_s18 = sphi %s2540_s18, %s3293_s18   ;;  %s2489_s17 = sphi %s2538_s17, %s3292_s17   ;;  %s2485_s16 = sphi %s2536_s16, %s3291_s16   ;;  %s2481_s15 = sphi %s2534_s15, %s3290_s15  }
   0x5   : > { %s36_s23 = sadd.s32 1, %s2497_s19  ;;  %s143_s24 = sadd.s32 1, %s2489_s17 }
   0x6   : > { %p38_p0 = scmp.ge.s32.totalorder %s36_s23, 2  ;;  %p153_p1 = scmp.ne.s32.totalorder %s2489_s17, %s2485_s16 }
   0x7   : > { %p154_p2 = scmp.eq.s32.totalorder %s1907_s21, 1  ;;  %p159_p3 = scmp.ne.s32.totalorder %s2485_s16, %s2481_s15 }
   0x8   : > { %s3296_s23 = smov (%p38_p0, %s36_s23), 0  ;;  %p160_p5 = scmp.eq.s32.totalorder %s1908_s22, 1 }
   0x9   : > { %p2574_p4 = por %p154_p2, %p153_p1  ;;  %s138_s26 = ssub.s32 %s2497_s19, %s3296_s23 }
   0xa   : > { %p1911_p6 = scmp.ge.s32.totalorder %s2501_s20, 1  ;;  %p141_p7 = scmp.eq.s32.totalorder %s138_s26, 0 }
   0xb   : > { %p2581_p8 = por %p160_p5, %p159_p3  ;;  %p210_p9 = scmp.lt.s32.totalorder %s2501_s20, 3 }
   0xc   : > { %s2587_s28 = scalar_select %p141_p7, %s2489_s17, %s143_s24  }
   0xd   : > { %p211_p10 = pnand %p1911_p6, %p210_p9 }
   0xe   : > { %v586_v0 = vld [vmem:[%s3272_s3 + $0x8] sm:$0xff] (!%p211_p10)  ;;  %v588_v1 = vld [vmem:[%s3272_s3 + $0x18] sm:$0xff] (!%p211_p10)  ;;  %v585_v2 = vld [vmem:[%s3272_s3] sm:$0xff] (!%p211_p10)  ;;  %p250_p11 = scmp.lt.s32.totalorder (!%p211_p10), %s2493_s18, 1  ;;  %v2503_v7 = vmov (!%p211_p10), 0.0   ;;  %vm294_vm0 = vcmask (!%p211_p10), 261120  }
   0xf   : > { %214 = sbr.rel (%p211_p10) target bundleno = 1162 (0x48a), region = 36  ;;  %v2193_v3 = vpack.c.bf16 (!%p211_p10), %v588_v1, %v586_v0  ;;  %v587_v4 = vld [vmem:[%s3272_s3 + $0x10] sm:$0xff] (!%p211_p10)  ;;  %v590_v5 = vld [vmem:[%s3272_s3 + $0x28] sm:$0xff] (!%p211_p10)  ;;  %v592_v6 = vld [vmem:[%s3272_s3 + $0x38] sm:$0xff] (!%p211_p10)  ;;  %706 = vmatprep.mubr.f32.mxu1 (!%p211_p10), %v2503_v7  ;;  %vm520_vm1 = vcmask (!%p211_p10), 7168   ;;  %s1956_s6 = sshll.u32 (!%p211_p10), %s2493_s18, 11 }
  0x10   : > { %v2195_v8 = vpack.c.bf16 (!%p211_p10), %v587_v4, %v585_v2  ;;  %v2197_v9 = vpack.c.bf16 (!%p211_p10), %v592_v6, %v590_v5  ;;  %v589_v10 = vld [vmem:[%s3272_s3 + $0x20] sm:$0xff] (!%p211_p10)  ;;  %v591_v11 = vld [vmem:[%s3272_s3 + $0x30] sm:$0xff] (!%p211_p10)  ;;  %v291_v13 = vld [vmem:[%s3271_s2 + $0x8] sm:$0xff] (!%p211_p10)  ;;  %537 = vst.msk [vmem:[#allocation4] sm:$0xff] (!%p211_p10), %vm520_vm1, %v2503_v7  ;;  %s3216_s10 = scalar_lea.hbm (!%p211_p10), %s3273_s4, %s1956_s6 }
  0x11   : > { %v290_v12 = vld [vmem:[%s3271_s2] sm:$0xff] (!%p211_p10)  ;;  %2194 = vmatprep.subr.bf16.mxu1 (!%p211_p10), %v2193_v3  ;;  %v292_v14 = vld [vmem:[%s3271_s2 + $0x10] sm:$0xff] (!%p211_p10)  ;;  %v293_v15 = vld [vmem:[%s3271_s2 + $0x18] sm:$0xff] (!%p211_p10)  ;;  %v2199_v16 = vpack.c.bf16 (!%p211_p10), %v591_v11, %v589_v10  ;;  %538 = vst.msk [vmem:[#allocation4 + $0x8] sm:$0xff] (!%p211_p10), %vm520_vm1, %v2503_v7 }
  0x12   : > { %2196 = vmatpush1.bf16.msra.mxu1 (!%p211_p10), %v2195_v8  ;;  %v2185_v17 = vpack.c.bf16 (!%p211_p10), %v291_v13, %v290_v12  ;;  %v2189_v18 = vpack.c.bf16 (!%p211_p10), %v293_v15, %v292_v14  ;;  %539 = vst.msk [vmem:[#allocation4 + $0x10] sm:$0xff] (!%p211_p10), %vm520_vm1, %v2503_v7  ;;  %540 = vst.msk [vmem:[#allocation4 + $0x18] sm:$0xff] (!%p211_p10), %vm520_vm1, %v2503_v7 }
  0x13   : > { %2198 = vmatprep.subr.bf16.mxu1 (!%p211_p10), %v2197_v9  ;;  %541 = vst.msk [vmem:[#allocation4 + $0x20] sm:$0xff] (!%p211_p10), %vm520_vm1, %v2503_v7  ;;  %542 = vst.msk [vmem:[#allocation4 + $0x28] sm:$0xff] (!%p211_p10), %vm520_vm1, %v2503_v7 }
  0x14   : > { %2186 = vmatprep.subr.bf16.mxu0 (!%p211_p10), %v2185_v17  ;;  %543 = vst.msk [vmem:[#allocation4 + $0x30] sm:$0xff] (!%p211_p10), %vm520_vm1, %v2503_v7  ;;  %544 = vst.msk [vmem:[#allocation4 + $0x38] sm:$0xff] (!%p211_p10), %vm520_vm1, %v2503_v7 }
  0x15   : > { %2188 = vmatpush3.bf16.msra.mxu0 (!%p211_p10), %v2185_v17  ;;  %545 = vst.msk [vmem:[#allocation4 + $0x40] sm:$0xff] (!%p211_p10), %vm520_vm1, %v2503_v7  ;;  %546 = vst.msk [vmem:[#allocation4 + $0x48] sm:$0xff] (!%p211_p10), %vm520_vm1, %v2503_v7 }
  0x16   : > { %s251_s29 = scalar_select %p250_p11, %s2493_s18, 1  ;;  %2200 = vmatpush1.bf16.msra.mxu1 %v2199_v16  ;;  %2190 = vmatprep.subr.bf16.mxu0 %v2189_v18  ;;  %547 = vst.msk [vmem:[#allocation4 + $0x50] sm:$0xff] %vm520_vm1, %v2503_v7  ;;  %548 = vst.msk [vmem:[#allocation4 + $0x58] sm:$0xff] %vm520_vm1, %v2503_v7 }
  0x17   : > { %549 = vst.msk [vmem:[#allocation4 + $0x60] sm:$0xff] %vm520_vm1, %v2503_v7  ;;  %550 = vst.msk [vmem:[#allocation4 + $0x68] sm:$0xff] %vm520_vm1, %v2503_v7 }
  0x18   : > { %s1954_s12 = sshll.u32 %s251_s29, 7  ;;  %551 = vst.msk [vmem:[#allocation4 + $0x70] sm:$0xff] %vm520_vm1, %v2503_v7  ;;  %552 = vst.msk [vmem:[#allocation4 + $0x78] sm:$0xff] %vm520_vm1, %v2503_v7  ;;  %s246_s29 = sand.u32 1, %s2485_s16  }
  0x19   : > { %s2631_s21 = scalar_lea.vmem %s3270_s1, %s1954_s12  ;;  %s2637_s26 = scalar_lea.vmem %s3269_s0, %s1954_s12  ;;  %2192 = vmatpush3.bf16.msra.mxu0 %v2189_v18 }
  0x1a   : > { %v569_v19 = vld [vmem:[%s2631_s21] sm:$0xff]  ;;  %v275_v21 = vld [vmem:[%s2637_s26 + $0x8] sm:$0xff]  ;;  %v276_v23 = vld [vmem:[%s2637_s26 + $0x10] sm:$0xff]  ;;  %s1912_s30 = sshll.u32 %s246_s29, 7  ;;  %s3223_s18 = scalar_lea.sflag [#allocation7], %s246_s29 }
  0x1b   : > { %1933 = vmatmul.mubr.msk.f32.vlgmr.msra.gmra.mrb[0].mxu1 %vm294_vm0, %v569_v19  ;;  %v274_v20 = vld [vmem:[%s2637_s26] sm:$0xff]  ;;  %v570_v22 = vld [vmem:[%s2631_s21 + $0x8] sm:$0xff]  ;;  %v277_v24 = vld [vmem:[%s2637_s26 + $0x18] sm:$0xff]  ;;  %s3183_s5 = scalar_lea.vmem [#allocation6], %s1912_s30  ;;  %s2506_s12 = smov [#allocation6]  }
  0x1c   : > { %712 = vmatprep.mubr.f32.mxu1 %v2503_v7  ;;  %2049 = vmatprep.mubr.msk.f32.mxu0 %vm294_vm0, %v274_v20  ;;  %v571_v25 = vld [vmem:[%s2631_s21 + $0x10] sm:$0xff]  ;;  %v278_v26 = vld [vmem:[%s2637_s26 + $0x20] sm:$0xff]  ;;  %v279_v27 = vld [vmem:[%s2637_s26 + $0x28] sm:$0xff]  ;;  %s1807_s7 = sshll.u32 %s3183_s5, 4  ;;  %s2427_s13 = sshll.u32 %s2506_s12, 4  ;;  %s3218_s7 = int_to_ptr.vmem [resolvable:$true] %s1807_s7  ;;  %s2428_s13 = int_to_ptr.vmem [resolvable:$false] %s2427_s13 }
  0x1d   : > { %2050 = vmatmul.mubr.msk.f32.vlgmr.msra.gmra.mrb[0].mxu0 %vm294_vm0, %v275_v21  ;;  %v572_v28 = vld [vmem:[%s2631_s21 + $0x18] sm:$0xff]  ;;  %v280_v29 = vld [vmem:[%s2637_s26 + $0x30] sm:$0xff]  ;;  %v573_v31 = vld [vmem:[%s2631_s21 + $0x20] sm:$0xff]  ;;  %s2423_s11 = scalar_lea.vmem %s3218_s7, 2048  ;;  %s2429_s14 = scalar_lea.vmem %s2428_s13, 4096 }
  0x1e   : > { %2052 = vmatprep.mubr.msk.f32.mxu0 %vm294_vm0, %v276_v23  ;;  %v281_v30 = vld [vmem:[%s2637_s26 + $0x38] sm:$0xff]  ;;  %v282_v32 = vld [vmem:[%s2637_s26 + $0x40] sm:$0xff]  ;;  %v283_v33 = vld [vmem:[%s2637_s26 + $0x48] sm:$0xff]  ;;  %p2424_p12 = scmp.ne.s32.totalorder %s3218_s7, %s2423_s11  ;;  %p2430_p1 = scmp.lt.s32.totalorder %s3218_s7, %s2428_s13 }
  0x1f   : > { %1934 = vmatmul.mubr.msk.f32.gmra.mrb[2].mxu1 %vm294_vm0, %v570_v22  ;;  %v574_v34 = vld [vmem:[%s2631_s21 + $0x28] sm:$0xff]  ;;  %v284_v35 = vld [vmem:[%s2637_s26 + $0x50] sm:$0xff]  ;;  %v285_v36 = vld [vmem:[%s2637_s26 + $0x58] sm:$0xff]  ;;  %p2431_p2 = scmp.lt.s32.totalorder %s2429_s14, %s2423_s11 }
  0x20   : > { %718 = vmatprep.mubr.f32.mxu1 %v2503_v7  ;;  %v575_v37 = vld [vmem:[%s2631_s21 + $0x30] sm:$0xff]  ;;  %v286_v38 = vld [vmem:[%s2637_s26 + $0x60] sm:$0xff]  ;;  %v287_v39 = vld [vmem:[%s2637_s26 + $0x68] sm:$0xff]  ;;  %p2425_p13 = pnand %p2424_p12, %p2574_p4 }
  0x21   : > { %2053 = vmatmul.mubr.msk.f32.gmra.mrb[2].mxu0 %vm294_vm0, %v277_v24  ;;  %v576_v40 = vld [vmem:[%s2631_s21 + $0x38] sm:$0xff]  ;;  %v288_v41 = vld [vmem:[%s2637_s26 + $0x70] sm:$0xff]  ;;  %v577_v43 = vld [vmem:[%s2631_s21 + $0x40] sm:$0xff]  ;;  %p2432_p3 = por %p2431_p2, %p2430_p1 }
  0x22   : > { %2055 = vmatprep.mubr.msk.f32.mxu0 %vm294_vm0, %v278_v26  ;;  %v289_v42 = vld [vmem:[%s2637_s26 + $0x78] sm:$0xff]  ;;  %v578_v44 = vld [vmem:[%s2631_s21 + $0x48] sm:$0xff]  ;;  %v579_v45 = vld [vmem:[%s2631_s21 + $0x50] sm:$0xff]  ;;  %p2426_p0 = pneg %p2425_p13 }
  0x23   : > { %1935 = vmatmul.mubr.msk.f32.gmra.mrb[4].mxu1 %vm294_vm0, %v571_v25  ;;  %v580_v46 = vld [vmem:[%s2631_s21 + $0x58] sm:$0xff]  ;;  %v581_v47 = vld [vmem:[%s2631_s21 + $0x60] sm:$0xff]  ;;  %v582_v48 = vld [vmem:[%s2631_s21 + $0x68] sm:$0xff] }
  0x24   : > { %724 = vmatprep.mubr.f32.mxu1 %v2503_v7  ;;  %v583_v49 = vld [vmem:[%s2631_s21 + $0x70] sm:$0xff]  ;;  %v584_v50 = vld [vmem:[%s2631_s21 + $0x78] sm:$0xff]  ;;  %p2433_p5 = pnand %p2432_p3, %p2426_p0 }
  0x25   : > { %2056 = vmatmul.mubr.msk.f32.gmra.mrb[4].mxu0 %vm294_vm0, %v279_v27 }
  0x26   : > { %2058 = vmatprep.mubr.msk.f32.mxu0 %vm294_vm0, %v280_v29 }
  0x27   : > { %1936 = vmatmul.mubr.msk.f32.gmra.mrb[6].mxu1 %vm294_vm0, %v572_v28 }
  0x28   : > { %730 = vmatprep.mubr.f32.mxu1 %v2503_v7 }
  0x29   : > { %2059 = vmatmul.mubr.msk.f32.gmra.mrb[6].mxu0 %vm294_vm0, %v281_v30 }
  0x2a   : > { %2061 = vmatprep.mubr.msk.f32.mxu0 %vm294_vm0, %v282_v32 }
  0x2b   : > { %1937 = vmatmul.mubr.msk.f32.gmra.mrb[8].mxu1 %vm294_vm0, %v573_v31 }
  0x2c   : > { %736 = vmatprep.mubr.f32.mxu1 %v2503_v7 }
  0x2d   : > { %2062 = vmatmul.mubr.msk.f32.gmra.mrb[8].mxu0 %vm294_vm0, %v283_v33 }
  0x2e   : > { %2064 = vmatprep.mubr.msk.f32.mxu0 %vm294_vm0, %v284_v35 }
  0x2f   : > { %1938 = vmatmul.mubr.msk.f32.gmra.mrb[10].mxu1 %vm294_vm0, %v574_v34 }
  0x30   : > { %742 = vmatprep.mubr.f32.mxu1 %v2503_v7 }
  0x31   : > { %2065 = vmatmul.mubr.msk.f32.gmra.mrb[10].mxu0 %vm294_vm0, %v285_v36 }
  0x32   : > { %2067 = vmatprep.mubr.msk.f32.mxu0 %vm294_vm0, %v286_v38 }
  0x33   : > { %1939 = vmatmul.mubr.msk.f32.gmra.mrb[12].mxu1 %vm294_vm0, %v575_v37 }
  0x34   : > { %748 = vmatprep.mubr.f32.mxu1 %v2503_v7 }
  0x35   : > { %2068 = vmatmul.mubr.msk.f32.gmra.mrb[12].mxu0 %vm294_vm0, %v287_v39 }
  0x36   : > { %2070 = vmatprep.mubr.msk.f32.mxu0 %vm294_vm0, %v288_v41 }
  0x37   : > { %1940 = vmatmul.mubr.msk.f32.gmra.mrb[14].mxu1 %vm294_vm0, %v576_v40 }
  0x38   : > { %754 = vmatprep.mubr.f32.mxu1 %v2503_v7 }
  0x39   : > { %2071 = vmatmul.mubr.msk.f32.gmra.mrb[14].mxu0 %vm294_vm0, %v289_v42 }
  0x3b   : > { %1941 = vmatmul.mubr.msk.f32.gmra.mrb[16].mxu1 %vm294_vm0, %v577_v43 }
  0x3c   : > { %760 = vmatprep.mubr.f32.mxu1 %v2503_v7 }
  0x3f   : > { %1942 = vmatmul.mubr.msk.f32.gmra.mrb[18].mxu1 %vm294_vm0, %v578_v44 }
  0x40   : > { %766 = vmatprep.mubr.f32.mxu1 %v2503_v7 }
  0x43   : > { %1943 = vmatmul.mubr.msk.f32.gmra.mrb[20].mxu1 %vm294_vm0, %v579_v45 }
  0x44   : > { %772 = vmatprep.mubr.f32.mxu1 %v2503_v7 }
  0x47   : > { %1944 = vmatmul.mubr.msk.f32.gmra.mrb[22].mxu1 %vm294_vm0, %v580_v46 }
  0x48   : > { %778 = vmatprep.mubr.f32.mxu1 %v2503_v7 }
  0x4b   : > { %1945 = vmatmul.mubr.msk.f32.gmra.mrb[24].mxu1 %vm294_vm0, %v581_v47 }
  0x4c   : > { %784 = vmatprep.mubr.f32.mxu1 %v2503_v7 }
  0x4f   : > { %1946 = vmatmul.mubr.msk.f32.gmra.mrb[26].mxu1 %vm294_vm0, %v582_v48 }
  0x50   : > { %790 = vmatprep.mubr.f32.mxu1 %v2503_v7 }
  0x53   : > { %1947 = vmatmul.mubr.msk.f32.gmra.mrb[28].mxu1 %vm294_vm0, %v583_v49 }
  0x54   : > { %796 = vmatprep.mubr.f32.mxu1 %v2503_v7 }
  0x57   : > { %1948 = vmatmul.mubr.msk.f32.gmra.mrb[30].mxu1 %vm294_vm0, %v584_v50 }
  0xee   : > { %v708_v51 = vpop.f32.mrb[0].mxu1 }
  0xef   : > { %v710_v52 = vpop.f32.mrb[1].mxu1 }
  0xf0   : > { %v2717_v53 = vpop.f32.mrb[0].mxu0 }
  0xf1   : > { %v409_v55 = vpop.f32.mrb[1].mxu0 }
  0xf2   : > { %v714_v54 = vpop.f32.mrb[2].mxu1  ;;  %v488_v58 = vmul.f32 0.17677669, %v409_v55  ;;  %v489_v55 = vmul.f32 0.17677669, %v2717_v53 }
  0xf3   : > { %v2201_v56 = vpack.c.bf16 %v714_v54, %v708_v51  ;;  %v716_v57 = vpop.f32.mrb[3].mxu1 }
  0xf4   : > { %v2233_v59 = vpack.c.bf16 %v716_v57, %v710_v52  ;;  %2105 = vmatprep.mubr.f32.mxu0 %v488_v58  ;;  %v2719_v60 = vpop.f32.mrb[2].mxu0 }
  0xf5   : > { %2202 = vmatprep.subr.bf16.mxu0 %v2201_v56  ;;  %v2721_v62 = vpop.f32.mrb[3].mxu0 }
  0xf6   : > { %v720_v61 = vpop.f32.mrb[4].mxu1  ;;  %2204 = vmatpush3.bf16.xpose.msra.mxu0 %v2201_v56  ;;  %2234 = vmatprep.subr.bf16.mxu1 %v2233_v59  ;;  %v490_v54 = vmul.f32 0.17677669, %v2721_v62  ;;  %v491_v56 = vmul.f32 0.17677669, %v2719_v60 }
  0xf7   : > { %v722_v63 = vpop.f32.mrb[5].mxu1  ;;  %2236 = vmatpush3.bf16.msra.mxu1 %v2233_v59 }
  0xf8   : > { %v2723_v0 = vpop.f32.mrb[4].mxu0 }
  0xf9   : > { %v2725_v2 = vpop.f32.mrb[5].mxu0  ;;  %v493_v58 = vmul.f32 0.17677669, %v2723_v0 }
  0xfa   : > { %v726_v1 = vpop.f32.mrb[6].mxu1  ;;  %v492_v57 = vmul.f32 0.17677669, %v2725_v2 }
  0xfb   : > { %v2205_v3 = vpack.c.bf16 %v726_v1, %v720_v61  ;;  %v728_v4 = vpop.f32.mrb[7].mxu1 }
  0xfc   : > { %v2237_v5 = vpack.c.bf16 %v728_v4, %v722_v63  ;;  %v2727_v6 = vpop.f32.mrb[6].mxu0  ;;  %v2504_v4 = vmov -inf  }
  0xfd   : > { %2206 = vmatprep.subr.bf16.mxu0 %v2205_v3  ;;  %v2729_v9 = vpop.f32.mrb[7].mxu0  ;;  %v495_v61 = vmul.f32 0.17677669, %v2727_v6  ;;  %521 = vst.msk [vmem:[#allocation3] sm:$0xff] %vm520_vm1, %v2504_v4  ;;  %522 = vst.msk [vmem:[#allocation3 + $0x8] sm:$0xff] %vm520_vm1, %v2504_v4 }
  0xfe   : > { %v732_v8 = vpop.f32.mrb[8].mxu1  ;;  %2208 = vmatpush3.bf16.xpose.msra.mxu0 %v2205_v3  ;;  %2238 = vmatprep.subr.bf16.mxu1 %v2237_v5  ;;  %v494_v59 = vmul.f32 0.17677669, %v2729_v9  ;;  %523 = vst.msk [vmem:[#allocation3 + $0x10] sm:$0xff] %vm520_vm1, %v2504_v4  ;;  %524 = vst.msk [vmem:[#allocation3 + $0x18] sm:$0xff] %vm520_vm1, %v2504_v4 }
  0xff   : > { %v734_v10 = vpop.f32.mrb[9].mxu1  ;;  %2240 = vmatpush3.bf16.msra.mxu1 %v2237_v5  ;;  %525 = vst.msk [vmem:[#allocation3 + $0x20] sm:$0xff] %vm520_vm1, %v2504_v4  ;;  %526 = vst.msk [vmem:[#allocation3 + $0x28] sm:$0xff] %vm520_vm1, %v2504_v4  ;;  %v965_v5 = vlaneseq }
 0x100   : > { %v2731_v11 = vpop.f32.mrb[8].mxu0  ;;  %527 = vst.msk [vmem:[#allocation3 + $0x30] sm:$0xff] %vm520_vm1, %v2504_v4  ;;  %528 = vst.msk [vmem:[#allocation3 + $0x38] sm:$0xff] %vm520_vm1, %v2504_v4 }
 0x101   : > { %v2733_v13 = vpop.f32.mrb[9].mxu0  ;;  %v497_v53 = vmul.f32 0.17677669, %v2731_v11  ;;  %529 = vst.msk [vmem:[#allocation3 + $0x40] sm:$0xff] %vm520_vm1, %v2504_v4  ;;  %530 = vst.msk [vmem:[#allocation3 + $0x48] sm:$0xff] %vm520_vm1, %v2504_v4  ;;  %v966_v6 = vand.u32 127, %v965_v5 }
 0x102   : > { %v738_v12 = vpop.f32.mrb[10].mxu1  ;;  %v496_v62 = vmul.f32 0.17677669, %v2733_v13  ;;  %531 = vst.msk [vmem:[#allocation3 + $0x50] sm:$0xff] %vm520_vm1, %v2504_v4  ;;  %532 = vst.msk [vmem:[#allocation3 + $0x58] sm:$0xff] %vm520_vm1, %v2504_v4 }
 0x103   : > { %v2209_v14 = vpack.c.bf16 %v738_v12, %v732_v8  ;;  %v740_v15 = vpop.f32.mrb[11].mxu1  ;;  %533 = vst.msk [vmem:[#allocation3 + $0x60] sm:$0xff] %vm520_vm1, %v2504_v4  ;;  %534 = vst.msk [vmem:[#allocation3 + $0x68] sm:$0xff] %vm520_vm1, %v2504_v4  ;;  %vm969_vm2 = vcmp.lt.s32.totalorder %v966_v6, 8 }
 0x104   : > { %v2241_v16 = vpack.c.bf16 %v740_v15, %v734_v10  ;;  %v2735_v17 = vpop.f32.mrb[10].mxu0  ;;  %535 = vst.msk [vmem:[#allocation3 + $0x70] sm:$0xff] %vm520_vm1, %v2504_v4  ;;  %536 = vst.msk [vmem:[#allocation3 + $0x78] sm:$0xff] %vm520_vm1, %v2504_v4 }
 0x105   : > { %2210 = vmatprep.subr.bf16.mxu0 %v2209_v14  ;;  %v2737_v19 = vpop.f32.mrb[11].mxu0  ;;  %v499_v63 = vmul.f32 0.17677669, %v2735_v17 }
 0x106   : > { %v744_v18 = vpop.f32.mrb[12].mxu1  ;;  %2212 = vmatpush3.bf16.xpose.msra.mxu0 %v2209_v14  ;;  %2242 = vmatprep.subr.bf16.mxu1 %v2241_v16  ;;  %v498_v60 = vmul.f32 0.17677669, %v2737_v19 }
 0x107   : > { %v746_v20 = vpop.f32.mrb[13].mxu1  ;;  %2244 = vmatpush3.bf16.msra.mxu1 %v2241_v16 }
 0x108   : > { %v2739_v21 = vpop.f32.mrb[12].mxu0  ;;  %v2938_v4 = vld [vmem:[#allocation3 + $0x40] sm:$0xff] }
 0x109   : > { %v2741_v23 = vpop.f32.mrb[13].mxu0  ;;  %v501_v1 = vmul.f32 0.17677669, %v2739_v21 }
 0x10a   : > { %v750_v22 = vpop.f32.mrb[14].mxu1  ;;  %v500_v0 = vmul.f32 0.17677669, %v2741_v23 }
 0x10b   : > { %v2213_v24 = vpack.c.bf16 %v750_v22, %v744_v18  ;;  %v752_v25 = vpop.f32.mrb[15].mxu1 }
 0x10c   : > { %v2245_v26 = vpack.c.bf16 %v752_v25, %v746_v20  ;;  %v2743_v27 = vpop.f32.mrb[14].mxu0 }
 0x10d   : > { %2214 = vmatprep.subr.bf16.mxu0 %v2213_v24  ;;  %v2745_v29 = vpop.f32.mrb[15].mxu0  ;;  %v503_v3 = vmul.f32 0.17677669, %v2743_v27 }
 0x10e   : > { %v756_v28 = vpop.f32.mrb[16].mxu1  ;;  %2216 = vmatpush3.bf16.xpose.msra.mxu0 %v2213_v24  ;;  %2246 = vmatprep.subr.bf16.mxu1 %v2245_v26  ;;  %v502_v2 = vmul.f32 0.17677669, %v2745_v29 }
 0x10f   : > { %v758_v30 = vpop.f32.mrb[17].mxu1  ;;  %2248 = vmatpush3.bf16.msra.mxu1 %v2245_v26  ;;  %v2505_v26 = vmov 0  }
 0x110   : > { %2325 = vset.pattern.permute.xlu0 %v2505_v26  ;;  %2326 = vset.pattern.permute.xlu1 %v2505_v26  ;;  %v2967_v26 = vld [vmem:[#allocation3 + $0x58] sm:$0xff] }
 0x112   : > { %v762_v31 = vpop.f32.mrb[18].mxu1 }
 0x113   : > { %v2217_v32 = vpack.c.bf16 %v762_v31, %v756_v28  ;;  %v764_v33 = vpop.f32.mrb[19].mxu1 }
 0x114   : > { %v2249_v34 = vpack.c.bf16 %v764_v33, %v758_v30 }
 0x115   : > { %2218 = vmatprep.subr.bf16.mxu0 %v2217_v32 }
 0x116   : > { %v768_v35 = vpop.f32.mrb[20].mxu1  ;;  %2220 = vmatpush3.bf16.xpose.msra.mxu0 %v2217_v32  ;;  %2250 = vmatprep.subr.bf16.mxu1 %v2249_v34 }
 0x117   : > { %v770_v36 = vpop.f32.mrb[21].mxu1  ;;  %2252 = vmatpush3.bf16.msra.mxu1 %v2249_v34 }
 0x11a   : > { %v774_v37 = vpop.f32.mrb[22].mxu1 }
 0x11b   : > { %v2221_v38 = vpack.c.bf16 %v774_v37, %v768_v35  ;;  %v776_v39 = vpop.f32.mrb[23].mxu1 }
 0x11c   : > { %v2253_v40 = vpack.c.bf16 %v776_v39, %v770_v36 }
 0x11d   : > { %2222 = vmatprep.subr.bf16.mxu0 %v2221_v38 }
 0x11e   : > { %v780_v41 = vpop.f32.mrb[24].mxu1  ;;  %2224 = vmatpush3.bf16.xpose.msra.mxu0 %v2221_v38  ;;  %2254 = vmatprep.subr.bf16.mxu1 %v2253_v40 }
 0x11f   : > { %v782_v42 = vpop.f32.mrb[25].mxu1  ;;  %2256 = vmatpush3.bf16.msra.mxu1 %v2253_v40  ;;  %v2874_v40 = vld [vmem:[#allocation3] sm:$0xff] }
 0x122   : > { %v786_v43 = vpop.f32.mrb[26].mxu1 }
 0x123   : > { %v2225_v44 = vpack.c.bf16 %v786_v43, %v780_v41  ;;  %v788_v45 = vpop.f32.mrb[27].mxu1  ;;  %v2879_v43 = vld [vmem:[#allocation3 + $0x18] sm:$0xff] }
 0x124   : > { %v2257_v46 = vpack.c.bf16 %v788_v45, %v782_v42 }
 0x125   : > { %2226 = vmatprep.subr.bf16.mxu0 %v2225_v44 }
 0x126   : > { %v792_v47 = vpop.f32.mrb[28].mxu1  ;;  %2228 = vmatpush3.bf16.xpose.msra.mxu0 %v2225_v44  ;;  %2258 = vmatprep.subr.bf16.mxu1 %v2257_v46  ;;  %v2881_v44 = vld [vmem:[#allocation3 + $0x8] sm:$0xff] }
 0x127   : > { %v794_v48 = vpop.f32.mrb[29].mxu1  ;;  %2260 = vmatpush3.bf16.msra.mxu1 %v2257_v46 }
 0x12a   : > { %v798_v49 = vpop.f32.mrb[30].mxu1 }
 0x12b   : > { %v2229_v50 = vpack.c.bf16 %v798_v49, %v792_v47  ;;  %v800_v51 = vpop.f32.mrb[31].mxu1 }
 0x12c   : > { %v2261_v52 = vpack.c.bf16 %v800_v51, %v794_v48 }
 0x12d   : > { %2230 = vmatprep.subr.bf16.mxu0 %v2229_v50 }
 0x12e   : > { %2232 = vmatpush3.bf16.xpose.msra.mxu0 %v2229_v50  ;;  %2262 = vmatprep.subr.bf16.mxu1 %v2261_v52  ;;  %v2894_v50 = vld [vmem:[#allocation3 + $0x10] sm:$0xff] }
 0x12f   : > { %2264 = vmatpush3.bf16.msra.mxu1 %v2261_v52  ;;  %v2900_v52 = vld [vmem:[#allocation3 + $0x20] sm:$0xff] }
 0x135   : > { %2106 = vmatmul.mubr.f32.vlgmr.msra.gmra.mrb[16].mxu0 %v489_v55 }
 0x136   : > { %2108 = vmatprep.mubr.f32.mxu0 %v490_v54 }
 0x139   : > { %2109 = vmatmul.mubr.f32.gmra.mrb[18].mxu0 %v491_v56 }
 0x13a   : > { %2111 = vmatprep.mubr.f32.mxu0 %v492_v57 }
 0x13d   : > { %2112 = vmatmul.mubr.f32.gmra.mrb[20].mxu0 %v493_v58  ;;  %v2910_v58 = vld [vmem:[#allocation3 + $0x28] sm:$0xff] }
 0x13e   : > { %2114 = vmatprep.mubr.f32.mxu0 %v494_v59 }
 0x141   : > { %2115 = vmatmul.mubr.f32.gmra.mrb[22].mxu0 %v495_v61 }
 0x142   : > { %2117 = vmatprep.mubr.f32.mxu0 %v496_v62  ;;  %v2919_v62 = vld [vmem:[#allocation3 + $0x30] sm:$0xff] }
 0x145   : > { %2118 = vmatmul.mubr.f32.gmra.mrb[24].mxu0 %v497_v53 }
 0x146   : > { %2120 = vmatprep.mubr.f32.mxu0 %v498_v60 }
 0x149   : > { %2121 = vmatmul.mubr.f32.gmra.mrb[26].mxu0 %v499_v63 }
 0x14a   : > { %2123 = vmatprep.mubr.f32.mxu0 %v500_v0 }
 0x14d   : > { %2124 = vmatmul.mubr.f32.gmra.mrb[28].mxu0 %v501_v1  ;;  %v2929_v1 = vld [vmem:[#allocation3 + $0x38] sm:$0xff] }
 0x14e   : > { %2126 = vmatprep.mubr.f32.mxu0 %v502_v2 }
 0x151   : > { %2127 = vmatmul.mubr.f32.gmra.mrb[30].mxu0 %v503_v3 }
 0x208   : > { %v2107_v8 = vpop.f32.mrb[16].mxu0 }
 0x209   : > { %v885_v9 = vpop.f32.mrb[17].mxu0  ;;  %v2819_v14 = vsel %vm969_vm2, %v2107_v8, -inf }
 0x20a   : > { %v2811_v10 = vsel %vm969_vm2, %v885_v9, -inf }
 0x20b   : > { %1002 = vmax.xlane.f32.xlu0 %v2811_v10 }
 0x20c   : > { %v2110_v11 = vpop.f32.mrb[18].mxu0 }
 0x20d   : > { %v2815_v12 = vsel %vm969_vm2, %v2110_v11, -inf  ;;  %v895_v13 = vpop.f32.mrb[19].mxu0  ;;  %v2948_v11 = vld [vmem:[#allocation3 + $0x48] sm:$0xff] }
 0x20e   : > { %1008 = vmax.xlane.f32.xlu1 %v2815_v12  ;;  %v2823_v7 = vsel %vm969_vm2, %v895_v13, -inf }
 0x20f   : > { %1004 = vmax.xlane.f32.xlu0 %v2819_v14 }
 0x210   : > { %v2113_v15 = vpop.f32.mrb[20].mxu0 }
 0x211   : > { %v905_v16 = vpop.f32.mrb[21].mxu0  ;;  %v2830_v18 = vsel %vm969_vm2, %v2113_v15, -inf }
 0x212   : > { %1006 = vmax.xlane.f32.xlu1 %v2823_v7  ;;  %v2827_v17 = vsel %vm969_vm2, %v905_v16, -inf  ;;  %v2957_v16 = vld [vmem:[#allocation3 + $0x50] sm:$0xff] }
 0x213   : > { %1010 = vmax.xlane.f32.xlu0 %v2827_v17 }
 0x214   : > { %v2116_v19 = vpop.f32.mrb[22].mxu0 }
 0x215   : > { %v915_v20 = vpop.f32.mrb[23].mxu0  ;;  %v2838_v22 = vsel %vm969_vm2, %v2116_v19, -inf }
 0x216   : > { %1012 = vmax.xlane.f32.xlu1 %v2830_v18  ;;  %v2835_v21 = vsel %vm969_vm2, %v915_v20, -inf }
 0x217   : > { %1014 = vmax.xlane.f32.xlu0 %v2835_v21 }
 0x218   : > { %v2119_v23 = vpop.f32.mrb[24].mxu0 }
 0x219   : > { %v925_v24 = vpop.f32.mrb[25].mxu0  ;;  %v2846_v27 = vsel %vm969_vm2, %v2119_v23, -inf }
 0x21a   : > { %1016 = vmax.xlane.f32.xlu1 %v2838_v22  ;;  %v2843_v25 = vsel %vm969_vm2, %v925_v24, -inf }
 0x21b   : > { %1018 = vmax.xlane.f32.xlu0 %v2843_v25 }
 0x21c   : > { %v2122_v28 = vpop.f32.mrb[26].mxu0 }
 0x21d   : > { %v935_v29 = vpop.f32.mrb[27].mxu0  ;;  %v2854_v31 = vsel %vm969_vm2, %v2122_v28, -inf }
 0x21e   : > { %1020 = vmax.xlane.f32.xlu1 %v2846_v27  ;;  %v2851_v30 = vsel %vm969_vm2, %v935_v29, -inf }
 0x21f   : > { %1022 = vmax.xlane.f32.xlu0 %v2851_v30 }
 0x220   : > { %v2125_v32 = vpop.f32.mrb[28].mxu0 }
 0x221   : > { %v945_v33 = vpop.f32.mrb[29].mxu0  ;;  %v2862_v35 = vsel %vm969_vm2, %v2125_v32, -inf  ;;  %v2977_v32 = vld [vmem:[#allocation3 + $0x60] sm:$0xff] }
 0x222   : > { %1024 = vmax.xlane.f32.xlu1 %v2854_v31  ;;  %v2859_v34 = vsel %vm969_vm2, %v945_v33, -inf }
 0x223   : > { %1026 = vmax.xlane.f32.xlu0 %v2859_v34 }
 0x224   : > { %v2128_v36 = vpop.f32.mrb[30].mxu0 }
 0x225   : > { %v955_v37 = vpop.f32.mrb[31].mxu0  ;;  %v2870_v39 = vsel %vm969_vm2, %v2128_v36, -inf }
 0x226   : > { %1028 = vmax.xlane.f32.xlu1 %v2862_v35  ;;  %v2867_v38 = vsel %vm969_vm2, %v955_v37, -inf }
 0x227   : > { %1030 = vmax.xlane.f32.xlu0 %v2867_v38 }
 0x22a   : > { %1032 = vmax.xlane.f32.xlu1 %v2870_v39 }
 0x298   : > { %v1003_v41 = vpop.xlane.xlu0 %1002 }
 0x299   : > { %v2877_v42 = vmax.f32 %v2874_v40, %v1003_v41 }
 0x29b   : > { %1612 = vst.msk [vmem:[#allocation3] sm:$0xff] %vm520_vm1, %v2877_v42  ;;  %v1009_v46 = vpop.xlane.xlu1 %1008  ;;  %1100 = vperm.xlu0 %2325, %v2877_v42  }
 0x29c   : > { %v2889_v47 = vmax.f32 %v2879_v43, %v1009_v46  ;;  %v1005_v48 = vpop.xlane.xlu0 %1004  ;;  %v2987_v46 = vld [vmem:[#allocation3 + $0x68] sm:$0xff] }
 0x29d   : > { %v2892_v49 = vmax.f32 %v2881_v44, %v1005_v48 }
 0x29e   : > { %1615 = vst.msk [vmem:[#allocation3 + $0x18] sm:$0xff] %vm520_vm1, %v2889_v47 }
 0x29f   : > { %v1051_v54 = vsub.f32 %v2881_v44, %v2892_v49  ;;  %1613 = vst.msk [vmem:[#allocation3 + $0x8] sm:$0xff] %vm520_vm1, %v2892_v49  ;;  %v1007_v55 = vpop.xlane.xlu1 %1006  ;;  %1105 = vperm.xlu1 %2326, %v2892_v49   ;;  %v3278_v44 = vsub.f32 %v2879_v43, %v2889_v47 }
 0x2a0   : > { %v2908_v56 = vmax.f32 %v2894_v50, %v1007_v55  ;;  %v1011_v57 = vpop.xlane.xlu0 %1010 }
 0x2a1   : > { %v2913_v59 = vmax.f32 %v2900_v52, %v1011_v57  ;;  %v2997_v57 = vld [vmem:[#allocation3 + $0x70] sm:$0xff]  ;;  %v1072_v49 = vmul.f32 1.442695, %v3278_v44 }
 0x2a2   : > { %v1052_v61 = vsub.f32 %v2894_v50, %v2908_v56  ;;  %1614 = vst.msk [vmem:[#allocation3 + $0x10] sm:$0xff] %vm520_vm1, %v2908_v56 }
 0x2a3   : > { %v1013_v53 = vpop.xlane.xlu1 %1012  ;;  %1115 = vperm.xlu1 %2326, %v2889_v47   ;;  %1616 = vst.msk [vmem:[#allocation3 + $0x20] sm:$0xff] %vm520_vm1, %v2913_v59 }
 0x2a4   : > { %v2927_v63 = vmax.f32 %v2910_v58, %v1013_v53  ;;  %v1015_v0 = vpop.xlane.xlu0 %1014 }
 0x2a5   : > { %v2932_v2 = vmax.f32 %v2919_v62, %v1015_v0 }
 0x2a6   : > { %1617 = vst.msk [vmem:[#allocation3 + $0x28] sm:$0xff] %vm520_vm1, %v2927_v63 }
 0x2a7   : > { %v1017_v5 = vpop.xlane.xlu1 %1016  ;;  %1110 = vperm.xlu1 %2326, %v2908_v56   ;;  %1618 = vst.msk [vmem:[#allocation3 + $0x30] sm:$0xff] %vm520_vm1, %v2932_v2 }
 0x2a8   : > { %v2946_v8 = vmax.f32 %v2929_v1, %v1017_v5  ;;  %v1019_v9 = vpop.xlane.xlu0 %1018 }
 0x2a9   : > { %v2951_v13 = vmax.f32 %v2938_v4, %v1019_v9 }
 0x2aa   : > { %1619 = vst.msk [vmem:[#allocation3 + $0x38] sm:$0xff] %vm520_vm1, %v2946_v8  ;;  %v3282_v43 = vsub.f32 %v2929_v1, %v2946_v8 }
 0x2ab   : > { %v1021_v19 = vpop.xlane.xlu1 %1020  ;;  %1125 = vperm.xlu1 %2326, %v2927_v63   ;;  %1620 = vst.msk [vmem:[#allocation3 + $0x40] sm:$0xff] %vm520_vm1, %v2951_v13 }
 0x2ac   : > { %v2965_v23 = vmax.f32 %v2948_v11, %v1021_v19  ;;  %v1023_v24 = vpop.xlane.xlu0 %1022  ;;  %v3007_v19 = vld [vmem:[#allocation3 + $0x78] sm:$0xff]  ;;  %v1080_v47 = vmul.f32 1.442695, %v3282_v43 }
 0x2ad   : > { %v2970_v28 = vmax.f32 %v2957_v16, %v1023_v24 }
 0x2ae   : > { %1621 = vst.msk [vmem:[#allocation3 + $0x48] sm:$0xff] %vm520_vm1, %v2965_v23  ;;  %1145 = vperm.xlu0 %2325, %v2965_v23  }
 0x2af   : > { %v1025_v33 = vpop.xlane.xlu1 %1024  ;;  %1120 = vperm.xlu1 %2326, %v2913_v59   ;;  %1622 = vst.msk [vmem:[#allocation3 + $0x50] sm:$0xff] %vm520_vm1, %v2970_v28 }
 0x2b0   : > { %v2985_v37 = vmax.f32 %v2967_v26, %v1025_v33  ;;  %v1027_v41 = vpop.xlane.xlu0 %1026 }
 0x2b1   : > { %v2990_v48 = vmax.f32 %v2977_v32, %v1027_v41 }
 0x2b2   : > { %1623 = vst.msk [vmem:[#allocation3 + $0x58] sm:$0xff] %vm520_vm1, %v2985_v37  ;;  %1155 = vperm.xlu0 %2325, %v2985_v37  }
 0x2b3   : > { %v1029_v53 = vpop.xlane.xlu1 %1028  ;;  %1135 = vperm.xlu1 %2326, %v2946_v8   ;;  %1624 = vst.msk [vmem:[#allocation3 + $0x60] sm:$0xff] %vm520_vm1, %v2990_v48  ;;  %v3285_v1 = vsub.f32 %v2977_v32, %v2990_v48 }
 0x2b4   : > { %v3005_v5 = vmax.f32 %v2987_v46, %v1029_v53  ;;  %v1031_v9 = vpop.xlane.xlu0 %1030 }
 0x2b5   : > { %v3010_v24 = vmax.f32 %v2997_v57, %v1031_v9  ;;  %v1090_v8 = vmul.f32 1.442695, %v3285_v1 }
 0x2b6   : > { %1625 = vst.msk [vmem:[#allocation3 + $0x68] sm:$0xff] %vm520_vm1, %v3005_v5  ;;  %1165 = vperm.xlu0 %2325, %v3005_v5   ;;  %v3288_v32 = vsub.f32 %v2987_v46, %v3005_v5 }
 0x2b7   : > { %1130 = vperm.xlu1 %2326, %v2932_v2   ;;  %v1033_v41 = vpop.xlane.xlu1 %1032  ;;  %1626 = vst.msk [vmem:[#allocation3 + $0x70] sm:$0xff] %vm520_vm1, %v3010_v24 }
 0x2b8   : > { %v3023_v9 = vmax.f32 %v3007_v19, %v1033_v41 }
 0x2ba   : > { %1627 = vst.msk [vmem:[#allocation3 + $0x78] sm:$0xff] %vm520_vm1, %v3023_v9  ;;  %1175 = vperm.xlu0 %2325, %v3023_v9  }
 0x2bb   : > { %1140 = vperm.xlu1 %2326, %v2951_v13  }
 0x2bf   : > { %1150 = vperm.xlu1 %2326, %v2970_v28  }
 0x2c3   : > { %1160 = vperm.xlu1 %2326, %v2990_v48  }
 0x2c7   : > { %1170 = vperm.xlu1 %2326, %v3010_v24  }
 0x31a   : > { %v1101_v53 = vpop.permute.xlu0 %1100 }
 0x31b   : > { %v1178_v41 = vsub.f32 %v2811_v10, %v1101_v53 }
 0x31d   : > { %v1194_v55 = vmul.f32 1.442695, %v1178_v41 }
 0x31e   : > { %v1106_v0 = vpop.permute.xlu1 %1105 }
 0x31f   : > { %2327 = vpow2.f32 %v1194_v55  ;;  %v1179_v33 = vsub.f32 %v2819_v14, %v1106_v0 }
 0x321   : > { %v1196_v29 = vmul.f32 1.442695, %v1179_v33 }
 0x322   : > { %v1116_v36 = vpop.permute.xlu1 %1115 }
 0x323   : > { %2329 = vpow2.f32 %v1196_v29  ;;  %v1181_v15 = vsub.f32 %v2815_v12, %v1116_v36 }
 0x325   : > { %v1200_v20 = vmul.f32 1.442695, %v1181_v15 }
 0x326   : > { %v1111_v3 = vpop.permute.xlu1 %1110 }
 0x327   : > { %2331 = vpow2.f32 %v1200_v20  ;;  %v1180_v6 = vsub.f32 %v2823_v7, %v1111_v3 }
 0x329   : > { %v2328_v51 = vpop.eup %2327  ;;  %v1198_v60 = vmul.f32 1.442695, %v1180_v6 }
 0x32a   : > { %v1126_v45 = vpop.permute.xlu1 %1125  ;;  %1258 = vadd.xlane.f32.xlu1 %v2328_v51  ;;  %2161 = vmatprep.mubr.f32.mxu1 %v2328_v51 }
 0x32b   : > { %2333 = vpow2.f32 %v1198_v60  ;;  %v1183_v10 = vsub.f32 %v2830_v18, %v1126_v45 }
 0x32d   : > { %v2330_v55 = vpop.eup %2329  ;;  %v1204_v14 = vmul.f32 1.442695, %v1183_v10  ;;  %v1146_v0 = vpop.permute.xlu0 %1145 }
 0x32e   : > { %v1121_v33 = vpop.permute.xlu1 %1120  ;;  %1260 = vadd.xlane.f32.xlu0 %v2330_v55  ;;  %2162 = vmatmul.mubr.f32.vlgmr.msra.gmra.mrb[32].mxu1 %v2330_v55  ;;  %v1187_v60 = vsub.f32 %v2846_v27, %v1146_v0 }
 0x32f   : > { %2335 = vpow2.f32 %v1204_v14  ;;  %v1182_v12 = vsub.f32 %v2827_v17, %v1121_v33 }
 0x330   : > { %v1212_v17 = vmul.f32 1.442695, %v1187_v60 }
 0x331   : > { %v2332_v15 = vpop.eup %2331  ;;  %v1202_v20 = vmul.f32 1.442695, %v1182_v12  ;;  %v1156_v7 = vpop.permute.xlu0 %1155 }
 0x332   : > { %v1136_v3 = vpop.permute.xlu1 %1135  ;;  %1264 = vadd.xlane.f32.xlu1 %v2332_v15  ;;  %v1189_v53 = vsub.f32 %v2854_v31, %v1156_v7 }
 0x333   : > { %2337 = vpow2.f32 %v1202_v20  ;;  %v1185_v51 = vsub.f32 %v2838_v22, %v1136_v3 }
 0x334   : > { %v1216_v27 = vmul.f32 1.442695, %v1189_v53 }
 0x335   : > { %v2334_v18 = vpop.eup %2333  ;;  %v1208_v45 = vmul.f32 1.442695, %v1185_v51  ;;  %v1166_v29 = vpop.permute.xlu0 %1165 }
 0x336   : > { %v1131_v6 = vpop.permute.xlu1 %1130  ;;  %1262 = vadd.xlane.f32.xlu0 %v2334_v18  ;;  %2164 = vmatprep.mubr.f32.mxu1 %v2334_v18  ;;  %v1191_v14 = vsub.f32 %v2862_v35, %v1166_v29 }
 0x337   : > { %2339 = vpow2.f32 %v1208_v45  ;;  %v1184_v36 = vsub.f32 %v2835_v21, %v1131_v6  ;;  %2165 = vmatmul.mubr.f32.gmra.mrb[34].mxu1 %v2332_v15 }
 0x338   : > { %v1220_v31 = vmul.f32 1.442695, %v1191_v14  ;;  %v3277_v14 = vsub.f32 %v2900_v52, %v2913_v59  ;;  %v3281_v52 = vsub.f32 %v2938_v4, %v2951_v13  ;;  %v3284_v4 = vsub.f32 %v2948_v11, %v2965_v23 }
 0x339   : > { %v2336_v41 = vpop.eup %2335  ;;  %v1206_v10 = vmul.f32 1.442695, %v1184_v36  ;;  %v1176_v33 = vpop.permute.xlu0 %1175  ;;  %v3287_v11 = vsub.f32 %v2997_v57, %v3010_v24  ;;  %v3289_v57 = vsub.f32 %v3007_v19, %v3023_v9  ;;  %v1226_v9 = vld [vmem:[#allocation4] sm:$0xff] }
 0x33a   : > { %v1141_v55 = vpop.permute.xlu1 %1140  ;;  %1268 = vadd.xlane.f32.xlu1 %v2336_v41  ;;  %v1193_v15 = vsub.f32 %v2870_v39, %v1176_v33  ;;  %v1082_v59 = vmul.f32 1.442695, %v3281_v52  ;;  %v1084_v13 = vmul.f32 1.442695, %v3284_v4  ;;  %v1234_v4 = vld [vmem:[#allocation4 + $0x40] sm:$0xff] }
 0x33b   : > { %2341 = vpow2.f32 %v1206_v10  ;;  %v1186_v22 = vsub.f32 %v2843_v25, %v1141_v55  ;;  %v1068_v10 = vmul.f32 1.442695, %v1051_v54  ;;  %v1070_v55 = vmul.f32 1.442695, %v1052_v61 }
 0x33c   : > { %2343 = vpow2.f32 %v1212_v17  ;;  %v1224_v51 = vmul.f32 1.442695, %v1193_v15  ;;  %v3279_v54 = vsub.f32 %v2919_v62, %v2932_v2  ;;  %v1094_v23 = vmul.f32 1.442695, %v3287_v11 }
 0x33d   : > { %v2338_v0 = vpop.eup %2337  ;;  %v1210_v12 = vmul.f32 1.442695, %v1186_v22  ;;  %v3276_v22 = vsub.f32 %v2874_v40, %v2877_v42  ;;  %v3280_v40 = vsub.f32 %v2910_v58, %v2927_v63  ;;  %v3283_v58 = vsub.f32 %v2957_v16, %v2970_v28 }
 0x33e   : > { %v1151_v20 = vpop.permute.xlu1 %1150  ;;  %1266 = vadd.xlane.f32.xlu0 %v2338_v0  ;;  %2167 = vmatprep.mubr.f32.mxu1 %v2338_v0  ;;  %v1074_v0 = vmul.f32 1.442695, %v3277_v14  ;;  %v1078_v50 = vmul.f32 1.442695, %v3279_v54  ;;  %v3286_v16 = vsub.f32 %v2967_v26, %v2985_v37  ;;  %v1092_v26 = vmul.f32 1.442695, %v3288_v32 }
 0x33f   : > { %2345 = vpow2.f32 %v1210_v12  ;;  %v1188_v21 = vsub.f32 %v2851_v30, %v1151_v20  ;;  %2168 = vmatmul.mubr.f32.gmra.mrb[36].mxu1 %v2336_v41  ;;  %v1076_v42 = vmul.f32 1.442695, %v3280_v40  ;;  %v1086_v62 = vmul.f32 1.442695, %v3283_v58  ;;  %v1233_v54 = vld [vmem:[#allocation4 + $0x38] sm:$0xff] }
 0x340   : > { %2347 = vpow2.f32 %v1216_v27  ;;  %v1066_v27 = vmul.f32 1.442695, %v3276_v22  ;;  %v1088_v28 = vmul.f32 1.442695, %v3286_v16  ;;  %v1096_v24 = vmul.f32 1.442695, %v3289_v57 }
 0x341   : > { %v2340_v7 = vpop.eup %2339  ;;  %v1214_v25 = vmul.f32 1.442695, %v1188_v21  ;;  %v1239_v57 = vld [vmem:[#allocation4 + $0x68] sm:$0xff] }
 0x342   : > { %v1161_v3 = vpop.permute.xlu1 %1160  ;;  %1272 = vadd.xlane.f32.xlu1 %v2340_v7 }
 0x343   : > { %2349 = vpow2.f32 %v1214_v25  ;;  %v1190_v35 = vsub.f32 %v2859_v34, %v1161_v3 }
 0x344   : > { %2351 = vpow2.f32 %v1220_v31 }
 0x345   : > { %v2342_v60 = vpop.eup %2341  ;;  %v1218_v18 = vmul.f32 1.442695, %v1190_v35  ;;  %v1227_v35 = vld [vmem:[#allocation4 + $0x8] sm:$0xff] }
 0x346   : > { %v2344_v45 = vpop.eup %2343  ;;  %1270 = vadd.xlane.f32.xlu0 %v2342_v60  ;;  %v1171_v6 = vpop.permute.xlu1 %1170  ;;  %2170 = vmatprep.mubr.f32.mxu1 %v2342_v60 }
 0x347   : > { %2353 = vpow2.f32 %v1218_v18  ;;  %v1192_v30 = vsub.f32 %v2867_v38, %v1171_v6  ;;  %1276 = vadd.xlane.f32.xlu1 %v2344_v45  ;;  %2171 = vmatmul.mubr.f32.gmra.mrb[38].mxu1 %v2340_v7 }
 0x348   : > { %2355 = vpow2.f32 %v1224_v51 }
 0x349   : > { %v2346_v39 = vpop.eup %2345  ;;  %v1222_v29 = vmul.f32 1.442695, %v1192_v30 }
 0x34a   : > { %v2348_v36 = vpop.eup %2347  ;;  %1274 = vadd.xlane.f32.xlu0 %v2346_v39  ;;  %2173 = vmatprep.mubr.f32.mxu1 %v2346_v39 }
 0x34b   : > { %2357 = vpow2.f32 %v1222_v29  ;;  %1280 = vadd.xlane.f32.xlu1 %v2348_v36  ;;  %2174 = vmatmul.mubr.f32.gmra.mrb[40].mxu1 %v2344_v45  ;;  %v1229_v45 = vld [vmem:[#allocation4 + $0x18] sm:$0xff]  ;;  %v1228_v29 = vld [vmem:[#allocation4 + $0x10] sm:$0xff] }
 0x34c   : > { %2359 = vpow2.f32 %v1068_v10 }
 0x34d   : > { %v2350_v34 = vpop.eup %2349  ;;  %2361 = vpow2.f32 %v1070_v55 }
 0x34e   : > { %v2352_v17 = vpop.eup %2351  ;;  %1278 = vadd.xlane.f32.xlu0 %v2350_v34  ;;  %2176 = vmatprep.mubr.f32.mxu1 %v2350_v34  ;;  %2363 = vpow2.f32 %v1066_v27  ;;  %v1230_v27 = vld [vmem:[#allocation4 + $0x20] sm:$0xff] }
 0x34f   : > { %1284 = vadd.xlane.f32.xlu1 %v2352_v17  ;;  %2177 = vmatmul.mubr.f32.gmra.mrb[42].mxu1 %v2348_v36  ;;  %2365 = vpow2.f32 %v1074_v0 }
 0x350   : > { %2367 = vpow2.f32 %v1072_v49 }
 0x351   : > { %v2354_v53 = vpop.eup %2353  ;;  %2369 = vpow2.f32 %v1078_v50 }
 0x352   : > { %v2356_v41 = vpop.eup %2355  ;;  %1282 = vadd.xlane.f32.xlu0 %v2354_v53  ;;  %2179 = vmatprep.mubr.f32.mxu1 %v2354_v53  ;;  %2371 = vpow2.f32 %v1076_v42 }
 0x353   : > { %1288 = vadd.xlane.f32.xlu1 %v2356_v41  ;;  %2180 = vmatmul.mubr.f32.gmra.mrb[44].mxu1 %v2352_v17  ;;  %2373 = vpow2.f32 %v1082_v59  ;;  %v1232_v59 = vld [vmem:[#allocation4 + $0x30] sm:$0xff] }
 0x354   : > { %2375 = vpow2.f32 %v1080_v47  ;;  %v1235_v47 = vld [vmem:[#allocation4 + $0x48] sm:$0xff] }
 0x355   : > { %v2358_v38 = vpop.eup %2357  ;;  %2377 = vpow2.f32 %v1086_v62 }
 0x356   : > { %1286 = vadd.xlane.f32.xlu0 %v2358_v38  ;;  %2182 = vmatprep.mubr.f32.mxu1 %v2358_v38  ;;  %v2360_v56 = vpop.eup %2359  ;;  %2379 = vpow2.f32 %v1084_v13 }
 0x357   : > { %2183 = vmatmul.mubr.f32.gmra.mrb[46].mxu1 %v2356_v41  ;;  %v3074_v61 = vpop.eup %2361  ;;  %2381 = vpow2.f32 %v1090_v8  ;;  %v1243_v60 = vmul.f32 %v2360_v56, %v1227_v35  ;;  %v1231_v41 = vld [vmem:[#allocation4 + $0x28] sm:$0xff] }
 0x358   : > { %v2364_v63 = vpop.eup %2363  ;;  %2383 = vpow2.f32 %v1088_v28  ;;  %v1244_v17 = vmul.f32 %v3074_v61, %v1228_v29 }
 0x359   : > { %v3083_v2 = vpop.eup %2365  ;;  %2385 = vpow2.f32 %v1094_v23  ;;  %v1242_v25 = vmul.f32 %v2364_v63, %v1226_v9 }
 0x35a   : > { %v2368_v33 = vpop.eup %2367  ;;  %2387 = vpow2.f32 %v1092_v26  ;;  %v1246_v44 = vmul.f32 %v3083_v2, %v1230_v27 }
 0x35b   : > { %v3092_v12 = vpop.eup %2369  ;;  %2389 = vpow2.f32 %v1096_v24  ;;  %v1245_v30 = vmul.f32 %v2368_v33, %v1229_v45 }
 0x35c   : > { %v2372_v20 = vpop.eup %2371  ;;  %v1248_v62 = vmul.f32 %v3092_v12, %v1232_v59 }
 0x35d   : > { %v3101_v21 = vpop.eup %2373  ;;  %v1247_v55 = vmul.f32 %v2372_v20, %v1231_v41 }
 0x35e   : > { %v2376_v37 = vpop.eup %2375  ;;  %v1250_v11 = vmul.f32 %v3101_v21, %v1234_v4 }
 0x35f   : > { %v3107_v48 = vpop.eup %2377  ;;  %v1249_v42 = vmul.f32 %v2376_v37, %v1233_v54 }
 0x360   : > { %v3113_v31 = vpop.eup %2379 }
 0x361   : > { %v3115_v15 = vpop.eup %2381 }
 0x362   : > { %v3119_v46 = vpop.eup %2383 }
 0x363   : > { %v3121_v5 = vpop.eup %2385 }
 0x364   : > { %1346 = vperm.xlu1 %2326, %v2360_v56   ;;  %v3125_v7 = vpop.eup %2387 }
 0x365   : > { %v3128_v19 = vpop.eup %2389 }
 0x368   : > { %1351 = vperm.xlu1 %2326, %v3074_v61  }
 0x36c   : > { %1361 = vperm.xlu1 %2326, %v3083_v2   ;;  %1341 = vperm.xlu0 %2325, %v2364_v63   ;;  %v1251_v63 = vmul.f32 %v3113_v31, %v1235_v47 }
 0x370   : > { %1371 = vperm.xlu1 %2326, %v3092_v12   ;;  %1356 = vperm.xlu0 %2325, %v2368_v33   ;;  %v1237_v33 = vld [vmem:[#allocation4 + $0x58] sm:$0xff] }
 0x371   : > { %v1253_v12 = vmul.f32 %v3119_v46, %v1237_v33 }
 0x374   : > { %1381 = vperm.xlu1 %2326, %v3101_v21   ;;  %1366 = vperm.xlu0 %2325, %v2372_v20   ;;  %v1236_v20 = vld [vmem:[#allocation4 + $0x50] sm:$0xff]  ;;  %v1255_v21 = vmul.f32 %v3125_v7, %v1239_v57 }
 0x375   : > { %v1252_v9 = vmul.f32 %v3107_v48, %v1236_v20 }
 0x378   : > { %1391 = vperm.xlu1 %2326, %v3107_v48   ;;  %1376 = vperm.xlu0 %2325, %v2376_v37  }
 0x37c   : > { %1401 = vperm.xlu1 %2326, %v3115_v15   ;;  %1386 = vperm.xlu0 %2325, %v3113_v31  }
 0x380   : > { %1411 = vperm.xlu1 %2326, %v3121_v5   ;;  %1396 = vperm.xlu0 %2325, %v3119_v46   ;;  %v1238_v46 = vld [vmem:[#allocation4 + $0x60] sm:$0xff] }
 0x384   : > { %1406 = vperm.xlu0 %2325, %v3125_v7  }
 0x388   : > { %1416 = vperm.xlu0 %2325, %v3128_v19  }
 0x3b7   : > { %v1259_v3 = vpop.xlane.xlu1 %1258 }
 0x3b8   : > { %v1290_v51 = vadd.f32 %v1259_v3, %v1242_v25 }
 0x3ba   : > { %1307 = vst.msk [vmem:[#allocation4] sm:$0xff] %vm520_vm1, %v1290_v51 }
 0x3bb   : > { %v1261_v18 = vpop.xlane.xlu0 %1260 }
 0x3bc   : > { %v1291_v6 = vadd.f32 %v1261_v18, %v1243_v60  ;;  %v1241_v60 = vld [vmem:[#allocation4 + $0x78] sm:$0xff] }
 0x3bd   : > { %v1257_v48 = vmul.f32 %v3128_v19, %v1241_v60 }
 0x3be   : > { %1308 = vst.msk [vmem:[#allocation4 + $0x8] sm:$0xff] %vm520_vm1, %v1291_v6  ;;  %v1254_v6 = vmul.f32 %v3115_v15, %v1238_v46 }
 0x3bf   : > { %v1265_v39 = vpop.xlane.xlu1 %1264 }
 0x3c0   : > { %v1293_v36 = vadd.f32 %v1265_v39, %v1245_v30  ;;  %v1240_v39 = vld [vmem:[#allocation4 + $0x70] sm:$0xff] }
 0x3c1   : > { %v1631_v34 = vld [vmem:[#allocation4] sm:$0xff]  ;;  %v1256_v41 = vmul.f32 %v3121_v5, %v1240_v39 }
 0x3c2   : > { %1310 = vst.msk [vmem:[#allocation4 + $0x18] sm:$0xff] %vm520_vm1, %v1293_v36  ;;  %2391 = vrcp.f32 %v1631_v34 }
 0x3c3   : > { %v1263_v53 = vpop.xlane.xlu0 %1262 }
 0x3c4   : > { %v1292_v38 = vadd.f32 %v1263_v53, %v1244_v17 }
 0x3c5   : > { %v1632_v10 = vld [vmem:[#allocation4 + $0x8] sm:$0xff] }
 0x3c6   : > { %1309 = vst.msk [vmem:[#allocation4 + $0x10] sm:$0xff] %vm520_vm1, %v1292_v38  ;;  %2393 = vrcp.f32 %v1632_v10 }
 0x3c7   : > { %v1269_v22 = vpop.xlane.xlu1 %1268 }
 0x3c8   : > { %v1295_v14 = vadd.f32 %v1269_v22, %v1247_v55 }
 0x3c9   : > { %v1634_v0 = vld [vmem:[#allocation4 + $0x18] sm:$0xff] }
 0x3ca   : > { %1312 = vst.msk [vmem:[#allocation4 + $0x28] sm:$0xff] %vm520_vm1, %v1295_v14  ;;  %2395 = vrcp.f32 %v1634_v0 }
 0x3cb   : > { %v1267_v49 = vpop.xlane.xlu0 %1266 }
 0x3cc   : > { %v2392_v50 = vpop.eup %2391  ;;  %v1294_v56 = vadd.f32 %v1267_v49, %v1246_v44 }
 0x3cd   : > { %1681 = vperm.xlu1 %2326, %v2392_v50   ;;  %v1633_v40 = vld [vmem:[#allocation4 + $0x10] sm:$0xff] }
 0x3ce   : > { %1311 = vst.msk [vmem:[#allocation4 + $0x20] sm:$0xff] %vm520_vm1, %v1294_v56  ;;  %2397 = vrcp.f32 %v1633_v40 }
 0x3cf   : > { %v1273_v52 = vpop.xlane.xlu1 %1272 }
 0x3d0   : > { %v2394_v61 = vpop.eup %2393  ;;  %v1297_v43 = vadd.f32 %v1273_v52, %v1249_v42 }
 0x3d1   : > { %1686 = vperm.xlu0 %2325, %v2394_v61   ;;  %v1636_v58 = vld [vmem:[#allocation4 + $0x28] sm:$0xff] }
 0x3d2   : > { %1314 = vst.msk [vmem:[#allocation4 + $0x38] sm:$0xff] %vm520_vm1, %v1297_v43  ;;  %2399 = vrcp.f32 %v1636_v58 }
 0x3d3   : > { %v1271_v2 = vpop.xlane.xlu0 %1270 }
 0x3d4   : > { %v2396_v13 = vpop.eup %2395  ;;  %v1277_v1 = vpop.xlane.xlu1 %1276  ;;  %v1296_v8 = vadd.f32 %v1271_v2, %v1248_v62 }
 0x3d5   : > { %v1299_v16 = vadd.f32 %v1277_v1, %v1251_v63  ;;  %1696 = vperm.xlu0 %2325, %v2396_v13   ;;  %v1635_v28 = vld [vmem:[#allocation4 + $0x20] sm:$0xff] }
 0x3d6   : > { %1313 = vst.msk [vmem:[#allocation4 + $0x30] sm:$0xff] %vm520_vm1, %v1296_v8  ;;  %2401 = vrcp.f32 %v1635_v28 }
 0x3d7   : > { %1316 = vst.msk [vmem:[#allocation4 + $0x48] sm:$0xff] %vm520_vm1, %v1299_v16  ;;  %v1275_v23 = vpop.xlane.xlu0 %1274 }
 0x3d8   : > { %v2398_v32 = vpop.eup %2397  ;;  %v1281_v26 = vpop.xlane.xlu1 %1280  ;;  %v1298_v37 = vadd.f32 %v1275_v23, %v1250_v11 }
 0x3d9   : > { %v1301_v24 = vadd.f32 %v1281_v26, %v1253_v12  ;;  %1691 = vperm.xlu1 %2326, %v2398_v32   ;;  %v1638_v31 = vld [vmem:[#allocation4 + $0x38] sm:$0xff] }
 0x3da   : > { %1315 = vst.msk [vmem:[#allocation4 + $0x40] sm:$0xff] %vm520_vm1, %v1298_v37  ;;  %2403 = vrcp.f32 %v1638_v31 }
 0x3db   : > { %1318 = vst.msk [vmem:[#allocation4 + $0x58] sm:$0xff] %vm520_vm1, %v1301_v24  ;;  %v1279_v25 = vpop.xlane.xlu0 %1278 }
 0x3dc   : > { %v2400_v3 = vpop.eup %2399  ;;  %v1285_v35 = vpop.xlane.xlu1 %1284  ;;  %v1300_v51 = vadd.f32 %v1279_v25, %v1252_v9 }
 0x3dd   : > { %v1303_v18 = vadd.f32 %v1285_v35, %v1255_v21  ;;  %1706 = vperm.xlu0 %2325, %v2400_v3   ;;  %v1637_v45 = vld [vmem:[#allocation4 + $0x30] sm:$0xff] }
 0x3de   : > { %1317 = vst.msk [vmem:[#allocation4 + $0x50] sm:$0xff] %vm520_vm1, %v1300_v51  ;;  %v1640_v30 = vld [vmem:[#allocation4 + $0x48] sm:$0xff]  ;;  %2405 = vrcp.f32 %v1637_v45 }
 0x3df   : > { %1320 = vst.msk [vmem:[#allocation4 + $0x68] sm:$0xff] %vm520_vm1, %v1303_v18  ;;  %v1283_v7 = vpop.xlane.xlu0 %1282  ;;  %2407 = vrcp.f32 %v1640_v30 }
 0x3e0   : > { %v2402_v29 = vpop.eup %2401  ;;  %v1289_v36 = vpop.xlane.xlu1 %1288  ;;  %v1302_v34 = vadd.f32 %v1283_v7, %v1254_v6 }
 0x3e1   : > { %v1305_v17 = vadd.f32 %v1289_v36, %v1257_v48  ;;  %1701 = vperm.xlu1 %2326, %v2402_v29   ;;  %v1639_v53 = vld [vmem:[#allocation4 + $0x40] sm:$0xff] }
 0x3e2   : > { %1319 = vst.msk [vmem:[#allocation4 + $0x60] sm:$0xff] %vm520_vm1, %v1302_v34  ;;  %v1642_v15 = vld [vmem:[#allocation4 + $0x58] sm:$0xff]  ;;  %2409 = vrcp.f32 %v1639_v53 }
 0x3e3   : > { %1322 = vst.msk [vmem:[#allocation4 + $0x78] sm:$0xff] %vm520_vm1, %v1305_v17  ;;  %v1287_v38 = vpop.xlane.xlu0 %1286  ;;  %2411 = vrcp.f32 %v1642_v15 }
 0x3e4   : > { %v2404_v19 = vpop.eup %2403  ;;  %v1304_v10 = vadd.f32 %v1287_v38, %v1256_v41  ;;  %v1347_v4 = vpop.permute.xlu1 %1346 }
 0x3e5   : > { %1716 = vperm.xlu0 %2325, %v2404_v19   ;;  %v1641_v55 = vld [vmem:[#allocation4 + $0x50] sm:$0xff]  ;;  %v1420_v6 = vmul.f32 0.0, %v1347_v4 }
 0x3e6   : > { %1321 = vst.msk [vmem:[#allocation4 + $0x70] sm:$0xff] %vm520_vm1, %v1304_v10  ;;  %v1644_v22 = vld [vmem:[#allocation4 + $0x68] sm:$0xff]  ;;  %2413 = vrcp.f32 %v1641_v55 }
 0x3e7   : > { %2415 = vrcp.f32 %v1644_v22 }
 0x3e8   : > { %v2406_v27 = vpop.eup %2405  ;;  %v1352_v28 = vpop.permute.xlu1 %1351 }
 0x3e9   : > { %v2408_v14 = vpop.eup %2407  ;;  %1711 = vperm.xlu1 %2326, %v2406_v27   ;;  %v1643_v0 = vld [vmem:[#allocation4 + $0x60] sm:$0xff]  ;;  %v1421_v17 = vmul.f32 0.0, %v1352_v28 }
 0x3ea   : > { %1726 = vperm.xlu0 %2325, %v2408_v14   ;;  %v1646_v5 = vld [vmem:[#allocation4 + $0x78] sm:$0xff]  ;;  %2417 = vrcp.f32 %v1643_v0 }
 0x3eb   : > { %2419 = vrcp.f32 %v1646_v5  ;;  %v1342_v8 = vpop.permute.xlu0 %1341 }
 0x3ec   : > { %v2410_v44 = vpop.eup %2409  ;;  %v1362_v20 = vpop.permute.xlu1 %1361  ;;  %v1419_v51 = vmul.f32 0.0, %v1342_v8 }
 0x3ed   : > { %v2412_v49 = vpop.eup %2411  ;;  %1721 = vperm.xlu1 %2326, %v2410_v44   ;;  %v1645_v54 = vld [vmem:[#allocation4 + $0x70] sm:$0xff]  ;;  %v1423_v22 = vmul.f32 0.0, %v1362_v20 }
 0x3ee   : > { %1736 = vperm.xlu0 %2325, %v2412_v49   ;;  %2421 = vrcp.f32 %v1645_v54 }
 0x3ef   : > { %v1357_v23 = vpop.permute.xlu0 %1356 }
 0x3f0   : > { %v2414_v50 = vpop.eup %2413  ;;  %v1372_v57 = vpop.permute.xlu1 %1371  ;;  %v1422_v39 = vmul.f32 0.0, %v1357_v23 }
 0x3f1   : > { %v2416_v56 = vpop.eup %2415  ;;  %1731 = vperm.xlu1 %2326, %v2414_v50   ;;  %v1425_v50 = vmul.f32 0.0, %v1372_v57 }
 0x3f2   : > { %1746 = vperm.xlu0 %2325, %v2416_v56  }
 0x3f3   : > { %v1367_v37 = vpop.permute.xlu0 %1366 }
 0x3f4   : > { %v2418_v40 = vpop.eup %2417  ;;  %v1382_v31 = vpop.permute.xlu1 %1381  ;;  %v1424_v38 = vmul.f32 0.0, %v1367_v37 }
 0x3f5   : > { %v2420_v42 = vpop.eup %2419  ;;  %1741 = vperm.xlu1 %2326, %v2418_v40  }
 0x3f6   : > { %1756 = vperm.xlu0 %2325, %v2420_v42  }
 0x3f7   : > { %v1377_v24 = vpop.permute.xlu0 %1376 }
 0x3f8   : > { %v2422_v52 = vpop.eup %2421  ;;  %v1392_v21 = vpop.permute.xlu1 %1391  ;;  %v1426_v5 = vmul.f32 0.0, %v1377_v24 }
 0x3f9   : > { %1751 = vperm.xlu1 %2326, %v2422_v52   ;;  %v1429_v28 = vmul.f32 0.0, %v1392_v21 }
 0x3fb   : > { %v1387_v9 = vpop.permute.xlu0 %1386 }
 0x3fc   : > { %v3176_v46 = vpop.permute.xlu1 %1401  ;;  %v1428_v40 = vmul.f32 0.0, %v1387_v9 }
 0x3ff   : > { %v1397_v25 = vpop.permute.xlu0 %1396 }
 0x400   : > { %v3179_v35 = vpop.permute.xlu1 %1411 }
 0x401   : > { %v2163_v59 = vpop.f32.mrb[32].mxu1 }
 0x402   : > { %v1501_v61 = vpop.f32.mrb[33].mxu1  ;;  %v1581_v48 = vadd.f32 %v2163_v59, %v1420_v6 }
 0x403   : > { %v1407_v3 = vpop.permute.xlu0 %1406  ;;  %v1580_v60 = vadd.f32 %v1501_v61, %v1419_v51  ;;  %v1427_v61 = vmul.f32 0.0, %v1382_v31 }
 0x407   : > { %v1417_v18 = vpop.permute.xlu0 %1416 }
 0x408   : > { %v1434_v9 = vmul.f32 0.0, %v1417_v18 }
 0x40a   : > { %v2166_v43 = vpop.f32.mrb[34].mxu1 }
 0x40b   : > { %v1511_v47 = vpop.f32.mrb[35].mxu1  ;;  %v1583_v36 = vadd.f32 %v2166_v43, %v1422_v39 }
 0x40c   : > { %v1582_v41 = vadd.f32 %v1511_v47, %v1421_v17 }
 0x412   : > { %v2169_v58 = vpop.f32.mrb[36].mxu1 }
 0x413   : > { %v1521_v62 = vpop.f32.mrb[37].mxu1  ;;  %v1585_v10 = vadd.f32 %v2169_v58, %v1424_v38  ;;  %v1430_v58 = vmul.f32 0.0, %v1397_v25 }
 0x414   : > { %v1584_v14 = vadd.f32 %v1521_v62, %v1423_v22 }
 0x41a   : > { %v2172_v63 = vpop.f32.mrb[38].mxu1 }
 0x41b   : > { %v3158_v2 = vpop.f32.mrb[39].mxu1  ;;  %v1587_v49 = vadd.f32 %v2172_v63, %v1426_v5 }
 0x41c   : > { %v1586_v42 = vadd.f32 %v3158_v2, %v1425_v50 }
 0x41e   : > { %v3160_v13 = vpop.f32.mrb[40].mxu1 }
 0x41f   : > { %v3162_v1 = vpop.f32.mrb[41].mxu1  ;;  %v1589_v52 = vadd.f32 %v3160_v13, %v1428_v40  ;;  %v1432_v13 = vmul.f32 0.0, %v1407_v3  ;;  %v1433_v3 = vmul.f32 0.0, %v3179_v35 }
 0x420   : > { %v1588_v63 = vadd.f32 %v3162_v1, %v1427_v61 }
 0x422   : > { %v3164_v33 = vpop.f32.mrb[42].mxu1 }
 0x423   : > { %v3166_v16 = vpop.f32.mrb[43].mxu1  ;;  %v1591_v4 = vadd.f32 %v3164_v33, %v1430_v58  ;;  %v1431_v33 = vmul.f32 0.0, %v3176_v46 }
 0x424   : > { %v1590_v37 = vadd.f32 %v3166_v16, %v1429_v28 }
 0x426   : > { %v3168_v11 = vpop.f32.mrb[44].mxu1 }
 0x427   : > { %v3170_v12 = vpop.f32.mrb[45].mxu1  ;;  %v1593_v57 = vadd.f32 %v3168_v11, %v1432_v13 }
 0x428   : > { %v1592_v25 = vadd.f32 %v3170_v12, %v1431_v33 }
 0x42a   : > { %v3172_v32 = vpop.f32.mrb[46].mxu1 }
 0x42b   : > { %v3174_v26 = vpop.f32.mrb[47].mxu1  ;;  %v1595_v16 = vadd.f32 %v3172_v32, %v1434_v9 }
 0x42c   : > { %v1594_v18 = vadd.f32 %v3174_v26, %v1433_v3 }
 0x44c   : > { %v1682_v45 = vpop.permute.xlu1 %1681 }
 0x44d   : > { %v1759_v30 = vmul.f32 %v1682_v45, %v1580_v60 }
 0x44f   : > { %1775 = vst [vmem:[%s3183_s5] sm:$0xff] %v1759_v30 }
 0x450   : > { %v1687_v7 = vpop.permute.xlu0 %1686 }
 0x451   : > { %v1760_v29 = vmul.f32 %v1687_v7, %v1581_v48 }
 0x453   : > { %1776 = vst [vmem:[%s3183_s5 + $0x8] sm:$0xff] %v1760_v29 }
 0x454   : > { %v1697_v34 = vpop.permute.xlu0 %1696 }
 0x455   : > { %v1762_v53 = vmul.f32 %v1697_v34, %v1583_v36 }
 0x457   : > { %1778 = vst [vmem:[%s3183_s5 + $0x18] sm:$0xff] %v1762_v53 }
 0x458   : > { %v1692_v15 = vpop.permute.xlu1 %1691 }
 0x459   : > { %v1761_v19 = vmul.f32 %v1692_v15, %v1582_v41 }
 0x45b   : > { %1777 = vst [vmem:[%s3183_s5 + $0x10] sm:$0xff] %v1761_v19 }
 0x45c   : > { %v1707_v55 = vpop.permute.xlu0 %1706 }
 0x45d   : > { %v1764_v27 = vmul.f32 %v1707_v55, %v1585_v10 }
 0x45f   : > { %1780 = vst [vmem:[%s3183_s5 + $0x28] sm:$0xff] %v1764_v27 }
 0x460   : > { %v1702_v0 = vpop.permute.xlu1 %1701 }
 0x461   : > { %v1763_v44 = vmul.f32 %v1702_v0, %v1584_v14 }
 0x463   : > { %1779 = vst [vmem:[%s3183_s5 + $0x20] sm:$0xff] %v1763_v44 }
 0x464   : > { %v1717_v54 = vpop.permute.xlu0 %1716 }
 0x465   : > { %v1766_v56 = vmul.f32 %v1717_v54, %v1587_v49 }
 0x467   : > { %1782 = vst [vmem:[%s3183_s5 + $0x38] sm:$0xff] %v1766_v56 }
 0x468   : > { %v1712_v59 = vpop.permute.xlu1 %1711 }
 0x469   : > { %v1765_v43 = vmul.f32 %v1712_v59, %v1586_v42  ;;  %v1727_v47 = vpop.permute.xlu0 %1726 }
 0x46a   : > { %v1768_v62 = vmul.f32 %v1727_v47, %v1589_v52 }
 0x46b   : > { %1781 = vst [vmem:[%s3183_s5 + $0x30] sm:$0xff] %v1765_v43 }
 0x46c   : > { %1784 = vst [vmem:[%s3183_s5 + $0x48] sm:$0xff] %v1768_v62  ;;  %v1722_v8 = vpop.permute.xlu1 %1721 }
 0x46d   : > { %v1767_v2 = vmul.f32 %v1722_v8, %v1588_v63  ;;  %v1737_v23 = vpop.permute.xlu0 %1736 }
 0x46e   : > { %v1770_v20 = vmul.f32 %v1737_v23, %v1591_v4 }
 0x46f   : > { %1783 = vst [vmem:[%s3183_s5 + $0x40] sm:$0xff] %v1767_v2 }
 0x470   : > { %1786 = vst [vmem:[%s3183_s5 + $0x58] sm:$0xff] %v1770_v20  ;;  %v1732_v1 = vpop.permute.xlu1 %1731 }
 0x471   : > { %v1769_v24 = vmul.f32 %v1732_v1, %v1590_v37  ;;  %v1747_v31 = vpop.permute.xlu0 %1746 }
 0x472   : > { %v1772_v21 = vmul.f32 %v1747_v31, %v1593_v57 }
 0x473   : > { %1785 = vst [vmem:[%s3183_s5 + $0x50] sm:$0xff] %v1769_v24 }
 0x474   : > { %1788 = vst [vmem:[%s3183_s5 + $0x68] sm:$0xff] %v1772_v21  ;;  %v1742_v11 = vpop.permute.xlu1 %1741 }
 0x475   : > { %v1771_v51 = vmul.f32 %v1742_v11, %v1592_v25  ;;  %v1757_v46 = vpop.permute.xlu0 %1756 }
 0x476   : > { %v1774_v60 = vmul.f32 %v1757_v46, %v1595_v16 }
 0x477   : > { %1787 = vst [vmem:[%s3183_s5 + $0x60] sm:$0xff] %v1771_v51 }
 0x478   : > { %1790 = vst [vmem:[%s3183_s5 + $0x78] sm:$0xff] %v1774_v60  ;;  %v1752_v12 = vpop.permute.xlu1 %1751 }
 0x479   : > { %v1773_v32 = vmul.f32 %v1752_v12, %v1594_v18 }
 0x47b   : > { %1789 = vst [vmem:[%s3183_s5 + $0x70] sm:$0xff] %v1773_v32 }
 0x47c   : > { %2436 = shalt.err (!%p2433_p5)
}
 0x47d   : > { %s2437_s21 = scalar_lea.hbm %s3216_s10, 2048  ;;  %s2441_s26 = scalar_lea.hbm %s3273_s4, 4096 }
 0x47e   : > { %p2438_p6 = scmp.ne.s32.totalorder %s3216_s10, %s2437_s21  ;;  %p2442_p10 = scmp.lt.u32.totalorder %s3216_s10, %s3273_s4 }
 0x47f   : > { %p2443_p11 = scmp.lt.u32.totalorder %s2441_s26, %s2437_s21  ;;  %p2445_p13 = scmp.lt.u32.totalorder %s2437_s21, %s3216_s10 }
 0x480   : > { %p2439_p7 = pnand %p2438_p6, %p2574_p4 }
 0x481   : > { %p2444_p12 = por %p2443_p11, %p2442_p10 }
 0x482   : > { %p2440_p9 = pneg %p2439_p7 }
 0x483   : > { %p2446_p0 = por %p2445_p13, %p2444_p12 }
 0x485   : > { %p2447_p1 = pnand %p2446_p0, %p2440_p9 }
 0x487   : > { %2450 = shalt.err (!%p2447_p1)
}
 0x488   : > { %s2507_s5 = smov 128   ;;  %s2508_s6 = smov 8  }
 0x489   : > { %2265 = dma.vmem_to_hbm [thread:$0]  (%p2574_p4), %s3218_s7, 2048, %s3216_s10, %s3223_s18, %s2507_s5, %s2507_s5, %s2508_s6  }
 0x48a PF: > { %p2271_p2 = scmp.ge.s32.totalorder %s2501_s20, 2  ;;  %s1822_s8 = sand.u32 1, %s2481_s15  }
 0x48b   : > { %s1823_s9 = scalar_lea.sflag [#allocation7], %s1822_s8 }
 0x48c   : > { %p2268_p3 = pnand %p2271_p2, %p2581_p8 }
 0x48e   : > { %2476 = dma.done.wait (!%p2268_p3), %s1823_s9, 2048  }
 0x48f   : > { %2478 = vsyncadd (!%p2268_p3), %s1823_s9, 4294965248  ;;  %s17_s20 = sadd.s32 1, %s2501_s20   ;;  %s3290_s15 = smov %s2485_s16 }
 0x490   : > { %p14_p5 = scmp.ge.s32.totalorder %s17_s20, 4   ;;  %s3291_s16 = smov %s2489_s17 }
 0x491   : > { %s3292_s17 = smov %s2587_s28  ;;  %s3293_s18 = smov %s2497_s19 }
 0x492   : > { %s3294_s19 = smov %s3296_s23  ;;  %16 = sbr.rel (!%p14_p5) target bundleno = 4 (0x4), region = 82 }
 0x499   :  { %1828 = vsyncpa [#allocation7], 1 }
 0x49a   :  { %1830 = vsyncpa [#allocation7 + $0x1], 1 }

</bundles_post_ra>
